<compile_context>
chip_gen: v6e
topology: v6e:2x2x1
jax: 0.10.0
libtpu: 0.0.40
codegen_flags: <defaults>
</compile_context>

<pallas_src>
import jax
import jax.numpy as jnp
from jax.experimental import pallas as pl
from jax.experimental.pallas import tpu as pltpu

# ---- model hyper-parameters (small test sizes consistent with the module) ----
VOCAB_SIZE = 32
EMBED_DIM = 32          # embedding_dim
N_HIDDEN = 32           # n_hidden (256 in the original; shrunk for the test)
N_LAYERS = 3            # n_layers
FC1_DIM = 128           # linear1 output
BATCH = 2
SEQ_LEN = 8
B_PAD = 8               # pad batch to the 8-sublane tile (full-vreg ops/stores)
V_PAD = 128             # pad vocab to a full 128-lane tile (lane-dense store)

# Stacked LSTM layers require input_size == hidden_size for layers > 0 anyway;
# EMBED_DIM == N_HIDDEN lets the per-layer weights stack into one array.
assert EMBED_DIM == N_HIDDEN


def _lstm_mlp_kernel(emb_ref,      # (T*BP, E)  f32  time-major, batch-padded embeddings
                     w_ih_ref,     # (L, E, 4H) f32  (pre-transposed)
                     w_hh_ref,     # (L, H, 4H) f32  (pre-transposed)
                     b_ref,        # (L, 1, 4H) f32  (b_ih + b_hh)
                     w1_ref,       # (H, 128)   f32  (pre-transposed)
                     b1_ref,       # (1, 128)   f32
                     w2_ref,       # (128, Vp)  f32  (pre-transposed, V padded)
                     b2_ref,       # (1, Vp)    f32  (padded lanes = -1e30)
                     out_ref):     # (BP, Vp)   f32  log-probs (padded rows/lanes junk)
    BP = out_ref.shape[0]
    H = w_hh_ref.shape[1]
    L = w_hh_ref.shape[0]
    T = emb_ref.shape[0] // BP
    G = 4 * H

    # ---- load weights once as register values (reused across the unroll) ----
    w_ih = [w_ih_ref[l] for l in range(L)]                   # (E, 4H) each
    w_hh = [w_hh_ref[l] for l in range(L)]                   # (H, 4H) each
    # Hoisted bias broadcasts for layers > 0 (layer 0 bias fused into xproj0).
    bias = [None] + [jnp.broadcast_to(b_ref[l], (BP, G)) for l in range(1, L)]

    # ---- hoisted layer-0 input projection: one big MXU matmul, bias fused ----
    # Register-resident: (T*BP, 4H) = (64, 128) f32 = 8 vregs.
    xproj0 = (jnp.dot(emb_ref[...], w_ih[0],
                      preferred_element_type=jnp.float32) + b_ref[0])

    def cell(gates, c_prev):
        # PyTorch gate order: input, forget, cell(g), output.
        # sigmoid / tanh applied once to the whole (BP, 4H) vreg (2 EUP pushes),
        # gates sliced from the results (lane slices; XLU slot otherwise idle).
        sig = jax.nn.sigmoid(gates)
        tnh = jnp.tanh(gates)
        i_g = sig[:, 0 * H:1 * H]
        f_g = sig[:, 1 * H:2 * H]
        g_g = tnh[:, 2 * H:3 * H]
        o_g = sig[:, 3 * H:4 * H]
        c_new = f_g * c_prev + i_g * g_g
        h_new = o_g * jnp.tanh(c_new)
        return h_new, c_new

    # Register-carried per-layer state.
    h = [jnp.zeros((BP, H), jnp.float32) for _ in range(L)]
    c = [jnp.zeros((BP, H), jnp.float32) for _ in range(L)]

    # ---- wavefront over the 3 layers: wave step s runs layer l at t = s - l ----
    # Fully unrolled (static trip count T + L - 1 = 10); within a wave step the
    # active layers are mutually independent -> up to 3-way MXU/EUP ILP.
    for s in range(T + L - 1):
        new_h = list(h)
        new_c = list(c)
        if s < T:
            # layer 0, time t = s: hoisted xproj slice (tile-aligned, static offset)
            g0 = (xproj0[s * BP:(s + 1) * BP, :]
                  + jnp.dot(h[0], w_hh[0], preferred_element_type=jnp.float32))
            new_h[0], new_c[0] = cell(g0, c[0])
        for l in range(1, L):
            t = s - l
            if 0 <= t < T:
                # input = layer l-1's output at time t == h[l-1] from wave step s-1
                gl = (jnp.dot(h[l - 1], w_ih[l], preferred_element_type=jnp.float32)
                      + jnp.dot(h[l], w_hh[l], preferred_element_type=jnp.float32)
                      + bias[l])
                new_h[l], new_c[l] = cell(gl, c[l])
        h, c = new_h, new_c

    # lstm_out[:, -1, :] == final hidden of the top layer.
    hid = jnp.dot(h[L - 1], w1_ref[...],
                  preferred_element_type=jnp.float32) + b1_ref[...]
    hid = jnp.maximum(hid, 0.0)                              # ReLU
    logits = jnp.dot(hid, w2_ref[...],
                     preferred_element_type=jnp.float32) + b2_ref[...]
    # log_softmax along dim=1; padded lanes carry -1e30 bias -> exp underflows
    # to exactly 0 and never wins the max, so they do not perturb the result.
    m = jnp.max(logits, axis=1, keepdims=True)
    z = logits - m
    lse = jnp.log(jnp.sum(jnp.exp(z), axis=1, keepdims=True))
    out_ref[...] = z - lse                                   # full (8,128) lane-dense store


@jax.jit
def composer_forward(tokens, params):
    # ---- glue (plain JAX): embedding gather + time-major flatten + batch pad ----
    B, T = tokens.shape
    emb = params["emb_table"][tokens]                        # (B, T, E)
    emb = jnp.transpose(emb, (1, 0, 2))                      # (T, B, E)
    emb = jnp.pad(emb, ((0, 0), (0, B_PAD - B), (0, 0)))     # (T, BP, E) zero-padded rows
    emb = emb.reshape(T * B_PAD, EMBED_DIM)                  # (T*BP, E)

    vmem = pl.BlockSpec(memory_space=pltpu.MemorySpace.VMEM)
    out_pad = pl.pallas_call(
        _lstm_mlp_kernel,
        out_shape=jax.ShapeDtypeStruct((B_PAD, V_PAD), jnp.float32),
        in_specs=[vmem] * 8,
        out_specs=vmem,
    )(emb,
      params["w_ih"], params["w_hh"], params["b"],
      params["w1"], params["b1"], params["w2_pad"], params["b2_pad"])
    return out_pad[:B, :VOCAB_SIZE]                          # (B, V) log-probs


def init_params(key):
    ks = jax.random.split(key, 10)
    s = 0.1
    emb_table = s * jax.random.normal(ks[0], (VOCAB_SIZE, EMBED_DIM), jnp.float32)
    # Per-layer LSTM weights (PyTorch shapes), pre-transposed for x @ W form.
    w_ih = s * jax.random.normal(ks[1], (N_LAYERS, 4 * N_HIDDEN, EMBED_DIM), jnp.float32)
    w_hh = s * jax.random.normal(ks[2], (N_LAYERS, 4 * N_HIDDEN, N_HIDDEN), jnp.float32)
    b_ih = s * jax.random.normal(ks[3], (N_LAYERS, 4 * N_HIDDEN), jnp.float32)
    b_hh = s * jax.random.normal(ks[4], (N_LAYERS, 4 * N_HIDDEN), jnp.float32)
    w1 = s * jax.random.normal(ks[5], (FC1_DIM, N_HIDDEN), jnp.float32)
    b1 = s * jax.random.normal(ks[6], (FC1_DIM,), jnp.float32)
    w2 = s * jax.random.normal(ks[7], (VOCAB_SIZE, FC1_DIM), jnp.float32)
    b2 = s * jax.random.normal(ks[8], (VOCAB_SIZE,), jnp.float32)

    w2_t = w2.T                                              # (128, V)
    b2_row = b2[None, :]                                     # (1, V)
    # Lane-pad the final projection: zero weight columns, -1e30 bias so the
    # padded logits vanish under log-sum-exp.
    w2_pad = jnp.zeros((FC1_DIM, V_PAD), jnp.float32).at[:, :VOCAB_SIZE].set(w2_t)
    b2_pad = jnp.full((1, V_PAD), -1e30, jnp.float32).at[:, :VOCAB_SIZE].set(b2_row)

    return {
        "emb_table": emb_table,
        "w_ih": jnp.transpose(w_ih, (0, 2, 1)),              # (L, E, 4H)
        "w_hh": jnp.transpose(w_hh, (0, 2, 1)),              # (L, H, 4H)
        "b": (b_ih + b_hh)[:, None, :],                      # (L, 1, 4H)
        "w1": w1.T,                                          # (H, 128)
        "b1": b1[None, :],                                   # (1, 128)
        "w2": w2_t,                                          # (128, V)  (reference)
        "b2": b2_row,                                        # (1, V)    (reference)
        "w2_pad": w2_pad,                                    # (128, Vp) (kernel)
        "b2_pad": b2_pad,                                    # (1, Vp)   (kernel)
    }


def reference_forward(tokens, params):
    """Pure-JAX reference mirroring the PyTorch forward (eval mode)."""
    emb = params["emb_table"][tokens]                        # (B, T, E)
    B = tokens.shape[0]
    x_seq = emb
    for l in range(N_LAYERS):
        h = jnp.zeros((B, N_HIDDEN), jnp.float32)
        c = jnp.zeros((B, N_HIDDEN), jnp.float32)
        outs = []
        for t in range(SEQ_LEN):
            gates = (x_seq[:, t, :] @ params["w_ih"][l]
                     + h @ params["w_hh"][l] + params["b"][l])
            H = N_HIDDEN
            i_g = jax.nn.sigmoid(gates[:, 0 * H:1 * H])
            f_g = jax.nn.sigmoid(gates[:, 1 * H:2 * H])
            g_g = jnp.tanh(gates[:, 2 * H:3 * H])
            o_g = jax.nn.sigmoid(gates[:, 3 * H:4 * H])
            c = f_g * c + i_g * g_g
            h = o_g * jnp.tanh(c)
            outs.append(h)
        x_seq = jnp.stack(outs, axis=1)
    last = x_seq[:, -1, :]
    hid = jnp.maximum(last @ params["w1"] + params["b1"], 0.0)
    logits = hid @ params["w2"] + params["b2"]
    return jax.nn.log_softmax(logits, axis=1)


if __name__ == "__main__":
    key = jax.random.PRNGKey(0)
    k_param, k_tok = jax.random.split(key)
    params = init_params(k_param)
    tokens = jax.random.randint(k_tok, (BATCH, SEQ_LEN), 0, VOCAB_SIZE, jnp.int32)

    log_probs = composer_forward(tokens, params)
    log_probs = jax.block_until_ready(log_probs)

    ref = reference_forward(tokens, params)
    assert log_probs.shape == (BATCH, VOCAB_SIZE)
    assert jnp.allclose(log_probs, ref, atol=1e-4, rtol=1e-4), (
        "Pallas kernel mismatch vs reference")
    print("KERNEL_OK")
</pallas_src>

<mosaic_0001>
module attributes {stable_mosaic.version = 11 : i64} {
  func.func @_lstm_mlp_kernel(%arg0: memref<64x32xf32, #tpu.memory_space<vmem>>, %arg1: memref<3x32x128xf32, #tpu.memory_space<vmem>>, %arg2: memref<3x32x128xf32, #tpu.memory_space<vmem>>, %arg3: memref<3x1x128xf32, #tpu.memory_space<vmem>>, %arg4: memref<32x128xf32, #tpu.memory_space<vmem>>, %arg5: memref<1x128xf32, #tpu.memory_space<vmem>>, %arg6: memref<128x128xf32, #tpu.memory_space<vmem>>, %arg7: memref<1x128xf32, #tpu.memory_space<vmem>>, %arg8: memref<8x128xf32, #tpu.memory_space<vmem>>) attributes {dimension_semantics = [], scalar_prefetch = 0 : i64, scratch_operands = 0 : i64, tpu.core_type = #tpu.core_type<tc>} {
    %c0 = arith.constant 0 : index
    %c0_0 = arith.constant 0 : index
    %c0_1 = arith.constant 0 : index
    %0 = vector.load %arg1[%c0, %c0_0, %c0_1] : memref<3x32x128xf32, #tpu.memory_space<vmem>>, vector<1x32x128xf32>
    %1 = vector.shape_cast %0 : vector<1x32x128xf32> to vector<32x128xf32>
    %c1 = arith.constant 1 : index
    %c0_2 = arith.constant 0 : index
    %c0_3 = arith.constant 0 : index
    %2 = vector.load %arg1[%c1, %c0_2, %c0_3] : memref<3x32x128xf32, #tpu.memory_space<vmem>>, vector<1x32x128xf32>
    %3 = vector.shape_cast %2 : vector<1x32x128xf32> to vector<32x128xf32>
    %c2 = arith.constant 2 : index
    %c0_4 = arith.constant 0 : index
    %c0_5 = arith.constant 0 : index
    %4 = vector.load %arg1[%c2, %c0_4, %c0_5] : memref<3x32x128xf32, #tpu.memory_space<vmem>>, vector<1x32x128xf32>
    %5 = vector.shape_cast %4 : vector<1x32x128xf32> to vector<32x128xf32>
    %c0_6 = arith.constant 0 : index
    %c0_7 = arith.constant 0 : index
    %c0_8 = arith.constant 0 : index
    %6 = vector.load %arg2[%c0_6, %c0_7, %c0_8] : memref<3x32x128xf32, #tpu.memory_space<vmem>>, vector<1x32x128xf32>
    %7 = vector.shape_cast %6 : vector<1x32x128xf32> to vector<32x128xf32>
    %c1_9 = arith.constant 1 : index
    %c0_10 = arith.constant 0 : index
    %c0_11 = arith.constant 0 : index
    %8 = vector.load %arg2[%c1_9, %c0_10, %c0_11] : memref<3x32x128xf32, #tpu.memory_space<vmem>>, vector<1x32x128xf32>
    %9 = vector.shape_cast %8 : vector<1x32x128xf32> to vector<32x128xf32>
    %c2_12 = arith.constant 2 : index
    %c0_13 = arith.constant 0 : index
    %c0_14 = arith.constant 0 : index
    %10 = vector.load %arg2[%c2_12, %c0_13, %c0_14] : memref<3x32x128xf32, #tpu.memory_space<vmem>>, vector<1x32x128xf32>
    %11 = vector.shape_cast %10 : vector<1x32x128xf32> to vector<32x128xf32>
    %c1_15 = arith.constant 1 : index
    %c0_16 = arith.constant 0 : index
    %c0_17 = arith.constant 0 : index
    %12 = vector.load %arg3[%c1_15, %c0_16, %c0_17] : memref<3x1x128xf32, #tpu.memory_space<vmem>>, vector<1x1x128xf32>
    %13 = vector.shape_cast %12 : vector<1x1x128xf32> to vector<1x128xf32>
    %14 = vector.shape_cast %13 : vector<1x128xf32> to vector<1x128xf32>
    %15 = vector.broadcast %14 : vector<1x128xf32> to vector<8x128xf32>
    %c2_18 = arith.constant 2 : index
    %c0_19 = arith.constant 0 : index
    %c0_20 = arith.constant 0 : index
    %16 = vector.load %arg3[%c2_18, %c0_19, %c0_20] : memref<3x1x128xf32, #tpu.memory_space<vmem>>, vector<1x1x128xf32>
    %17 = vector.shape_cast %16 : vector<1x1x128xf32> to vector<1x128xf32>
    %18 = vector.shape_cast %17 : vector<1x128xf32> to vector<1x128xf32>
    %19 = vector.broadcast %18 : vector<1x128xf32> to vector<8x128xf32>
    %c0_21 = arith.constant 0 : index
    %c0_22 = arith.constant 0 : index
    %20 = vector.load %arg0[%c0_21, %c0_22] : memref<64x32xf32, #tpu.memory_space<vmem>>, vector<64x32xf32>
    %cst = arith.constant dense<0.000000e+00> : vector<64x128xf32>
    %21 = tpu.matmul %20, %1, %cst {dimension_numbers = #tpu.dot_dimension_numbers<[1], [0], [0], [1], [0, 0, 1, 1], [], []>} : vector<64x32xf32>, vector<32x128xf32>, vector<64x128xf32> -> vector<64x128xf32>
    %c0_23 = arith.constant 0 : index
    %c0_24 = arith.constant 0 : index
    %c0_25 = arith.constant 0 : index
    %22 = vector.load %arg3[%c0_23, %c0_24, %c0_25] : memref<3x1x128xf32, #tpu.memory_space<vmem>>, vector<1x1x128xf32>
    %23 = vector.shape_cast %22 : vector<1x1x128xf32> to vector<1x128xf32>
    %24 = vector.broadcast %23 : vector<1x128xf32> to vector<64x128xf32>
    %25 = arith.addf %21, %24 : vector<64x128xf32>
    %cst_26 = arith.constant 0.000000e+00 : f32
    %26 = vector.broadcast %cst_26 : f32 to vector<8x32xf32>
    %cst_27 = arith.constant 0.000000e+00 : f32
    %27 = vector.broadcast %cst_27 : f32 to vector<8x32xf32>
    %cst_28 = arith.constant 0.000000e+00 : f32
    %28 = vector.broadcast %cst_28 : f32 to vector<8x32xf32>
    %cst_29 = arith.constant 0.000000e+00 : f32
    %29 = vector.broadcast %cst_29 : f32 to vector<8x32xf32>
    %cst_30 = arith.constant 0.000000e+00 : f32
    %30 = vector.broadcast %cst_30 : f32 to vector<8x32xf32>
    %cst_31 = arith.constant 0.000000e+00 : f32
    %31 = vector.broadcast %cst_31 : f32 to vector<8x32xf32>
    %32 = vector.extract_strided_slice %25 {offsets = [0, 0], sizes = [8, 128], strides = [1, 1]} : vector<64x128xf32> to vector<8x128xf32>
    %cst_32 = arith.constant dense<0.000000e+00> : vector<8x128xf32>
    %33 = tpu.matmul %26, %7, %cst_32 {dimension_numbers = #tpu.dot_dimension_numbers<[1], [0], [0], [1], [0, 0, 1, 1], [], []>} : vector<8x32xf32>, vector<32x128xf32>, vector<8x128xf32> -> vector<8x128xf32>
    %34 = arith.addf %32, %33 : vector<8x128xf32>
    %35 = arith.negf %34 : vector<8x128xf32>
    %36 = math.exp %35 : vector<8x128xf32>
    %cst_33 = arith.constant 1.000000e+00 : f32
    %37 = vector.broadcast %cst_33 : f32 to vector<8x128xf32>
    %38 = arith.addf %37, %36 : vector<8x128xf32>
    %39 = arith.divf %37, %38 : vector<8x128xf32>
    %40 = math.tanh %34 : vector<8x128xf32>
    %41 = vector.extract_strided_slice %39 {offsets = [0, 0], sizes = [8, 32], strides = [1, 1]} : vector<8x128xf32> to vector<8x32xf32>
    %42 = vector.extract_strided_slice %39 {offsets = [0, 32], sizes = [8, 32], strides = [1, 1]} : vector<8x128xf32> to vector<8x32xf32>
    %43 = vector.extract_strided_slice %40 {offsets = [0, 64], sizes = [8, 32], strides = [1, 1]} : vector<8x128xf32> to vector<8x32xf32>
    %44 = vector.extract_strided_slice %39 {offsets = [0, 96], sizes = [8, 32], strides = [1, 1]} : vector<8x128xf32> to vector<8x32xf32>
    %45 = arith.mulf %42, %29 : vector<8x32xf32>
    %46 = arith.mulf %41, %43 : vector<8x32xf32>
    %47 = arith.addf %45, %46 : vector<8x32xf32>
    %48 = math.tanh %47 : vector<8x32xf32>
    %49 = arith.mulf %44, %48 : vector<8x32xf32>
    %50 = vector.extract_strided_slice %25 {offsets = [8, 0], sizes = [8, 128], strides = [1, 1]} : vector<64x128xf32> to vector<8x128xf32>
    %cst_34 = arith.constant dense<0.000000e+00> : vector<8x128xf32>
    %51 = tpu.matmul %49, %7, %cst_34 {dimension_numbers = #tpu.dot_dimension_numbers<[1], [0], [0], [1], [0, 0, 1, 1], [], []>} : vector<8x32xf32>, vector<32x128xf32>, vector<8x128xf32> -> vector<8x128xf32>
    %52 = arith.addf %50, %51 : vector<8x128xf32>
    %53 = arith.negf %52 : vector<8x128xf32>
    %54 = math.exp %53 : vector<8x128xf32>
    %cst_35 = arith.constant 1.000000e+00 : f32
    %55 = vector.broadcast %cst_35 : f32 to vector<8x128xf32>
    %56 = arith.addf %55, %54 : vector<8x128xf32>
    %57 = arith.divf %55, %56 : vector<8x128xf32>
    %58 = math.tanh %52 : vector<8x128xf32>
    %59 = vector.extract_strided_slice %57 {offsets = [0, 0], sizes = [8, 32], strides = [1, 1]} : vector<8x128xf32> to vector<8x32xf32>
    %60 = vector.extract_strided_slice %57 {offsets = [0, 32], sizes = [8, 32], strides = [1, 1]} : vector<8x128xf32> to vector<8x32xf32>
    %61 = vector.extract_strided_slice %58 {offsets = [0, 64], sizes = [8, 32], strides = [1, 1]} : vector<8x128xf32> to vector<8x32xf32>
    %62 = vector.extract_strided_slice %57 {offsets = [0, 96], sizes = [8, 32], strides = [1, 1]} : vector<8x128xf32> to vector<8x32xf32>
    %63 = arith.mulf %60, %47 : vector<8x32xf32>
    %64 = arith.mulf %59, %61 : vector<8x32xf32>
    %65 = arith.addf %63, %64 : vector<8x32xf32>
    %66 = math.tanh %65 : vector<8x32xf32>
    %67 = arith.mulf %62, %66 : vector<8x32xf32>
    %cst_36 = arith.constant dense<0.000000e+00> : vector<8x128xf32>
    %68 = tpu.matmul %49, %3, %cst_36 {dimension_numbers = #tpu.dot_dimension_numbers<[1], [0], [0], [1], [0, 0, 1, 1], [], []>} : vector<8x32xf32>, vector<32x128xf32>, vector<8x128xf32> -> vector<8x128xf32>
    %cst_37 = arith.constant dense<0.000000e+00> : vector<8x128xf32>
    %69 = tpu.matmul %27, %9, %cst_37 {dimension_numbers = #tpu.dot_dimension_numbers<[1], [0], [0], [1], [0, 0, 1, 1], [], []>} : vector<8x32xf32>, vector<32x128xf32>, vector<8x128xf32> -> vector<8x128xf32>
    %70 = arith.addf %68, %69 : vector<8x128xf32>
    %71 = arith.addf %70, %15 : vector<8x128xf32>
    %72 = arith.negf %71 : vector<8x128xf32>
    %73 = math.exp %72 : vector<8x128xf32>
    %cst_38 = arith.constant 1.000000e+00 : f32
    %74 = vector.broadcast %cst_38 : f32 to vector<8x128xf32>
    %75 = arith.addf %74, %73 : vector<8x128xf32>
    %76 = arith.divf %74, %75 : vector<8x128xf32>
    %77 = math.tanh %71 : vector<8x128xf32>
    %78 = vector.extract_strided_slice %76 {offsets = [0, 0], sizes = [8, 32], strides = [1, 1]} : vector<8x128xf32> to vector<8x32xf32>
    %79 = vector.extract_strided_slice %76 {offsets = [0, 32], sizes = [8, 32], strides = [1, 1]} : vector<8x128xf32> to vector<8x32xf32>
    %80 = vector.extract_strided_slice %77 {offsets = [0, 64], sizes = [8, 32], strides = [1, 1]} : vector<8x128xf32> to vector<8x32xf32>
    %81 = vector.extract_strided_slice %76 {offsets = [0, 96], sizes = [8, 32], strides = [1, 1]} : vector<8x128xf32> to vector<8x32xf32>
    %82 = arith.mulf %79, %30 : vector<8x32xf32>
    %83 = arith.mulf %78, %80 : vector<8x32xf32>
    %84 = arith.addf %82, %83 : vector<8x32xf32>
    %85 = math.tanh %84 : vector<8x32xf32>
    %86 = arith.mulf %81, %85 : vector<8x32xf32>
    %87 = vector.extract_strided_slice %25 {offsets = [16, 0], sizes = [8, 128], strides = [1, 1]} : vector<64x128xf32> to vector<8x128xf32>
    %cst_39 = arith.constant dense<0.000000e+00> : vector<8x128xf32>
    %88 = tpu.matmul %67, %7, %cst_39 {dimension_numbers = #tpu.dot_dimension_numbers<[1], [0], [0], [1], [0, 0, 1, 1], [], []>} : vector<8x32xf32>, vector<32x128xf32>, vector<8x128xf32> -> vector<8x128xf32>
    %89 = arith.addf %87, %88 : vector<8x128xf32>
    %90 = arith.negf %89 : vector<8x128xf32>
    %91 = math.exp %90 : vector<8x128xf32>
    %cst_40 = arith.constant 1.000000e+00 : f32
    %92 = vector.broadcast %cst_40 : f32 to vector<8x128xf32>
    %93 = arith.addf %92, %91 : vector<8x128xf32>
    %94 = arith.divf %92, %93 : vector<8x128xf32>
    %95 = math.tanh %89 : vector<8x128xf32>
    %96 = vector.extract_strided_slice %94 {offsets = [0, 0], sizes = [8, 32], strides = [1, 1]} : vector<8x128xf32> to vector<8x32xf32>
    %97 = vector.extract_strided_slice %94 {offsets = [0, 32], sizes = [8, 32], strides = [1, 1]} : vector<8x128xf32> to vector<8x32xf32>
    %98 = vector.extract_strided_slice %95 {offsets = [0, 64], sizes = [8, 32], strides = [1, 1]} : vector<8x128xf32> to vector<8x32xf32>
    %99 = vector.extract_strided_slice %94 {offsets = [0, 96], sizes = [8, 32], strides = [1, 1]} : vector<8x128xf32> to vector<8x32xf32>
    %100 = arith.mulf %97, %65 : vector<8x32xf32>
    %101 = arith.mulf %96, %98 : vector<8x32xf32>
    %102 = arith.addf %100, %101 : vector<8x32xf32>
    %103 = math.tanh %102 : vector<8x32xf32>
    %104 = arith.mulf %99, %103 : vector<8x32xf32>
    %cst_41 = arith.constant dense<0.000000e+00> : vector<8x128xf32>
    %105 = tpu.matmul %67, %3, %cst_41 {dimension_numbers = #tpu.dot_dimension_numbers<[1], [0], [0], [1], [0, 0, 1, 1], [], []>} : vector<8x32xf32>, vector<32x128xf32>, vector<8x128xf32> -> vector<8x128xf32>
    %cst_42 = arith.constant dense<0.000000e+00> : vector<8x128xf32>
    %106 = tpu.matmul %86, %9, %cst_42 {dimension_numbers = #tpu.dot_dimension_numbers<[1], [0], [0], [1], [0, 0, 1, 1], [], []>} : vector<8x32xf32>, vector<32x128xf32>, vector<8x128xf32> -> vector<8x128xf32>
    %107 = arith.addf %105, %106 : vector<8x128xf32>
    %108 = arith.addf %107, %15 : vector<8x128xf32>
    %109 = arith.negf %108 : vector<8x128xf32>
    %110 = math.exp %109 : vector<8x128xf32>
    %cst_43 = arith.constant 1.000000e+00 : f32
    %111 = vector.broadcast %cst_43 : f32 to vector<8x128xf32>
    %112 = arith.addf %111, %110 : vector<8x128xf32>
    %113 = arith.divf %111, %112 : vector<8x128xf32>
    %114 = math.tanh %108 : vector<8x128xf32>
    %115 = vector.extract_strided_slice %113 {offsets = [0, 0], sizes = [8, 32], strides = [1, 1]} : vector<8x128xf32> to vector<8x32xf32>
    %116 = vector.extract_strided_slice %113 {offsets = [0, 32], sizes = [8, 32], strides = [1, 1]} : vector<8x128xf32> to vector<8x32xf32>
    %117 = vector.extract_strided_slice %114 {offsets = [0, 64], sizes = [8, 32], strides = [1, 1]} : vector<8x128xf32> to vector<8x32xf32>
    %118 = vector.extract_strided_slice %113 {offsets = [0, 96], sizes = [8, 32], strides = [1, 1]} : vector<8x128xf32> to vector<8x32xf32>
    %119 = arith.mulf %116, %84 : vector<8x32xf32>
    %120 = arith.mulf %115, %117 : vector<8x32xf32>
    %121 = arith.addf %119, %120 : vector<8x32xf32>
    %122 = math.tanh %121 : vector<8x32xf32>
    %123 = arith.mulf %118, %122 : vector<8x32xf32>
    %cst_44 = arith.constant dense<0.000000e+00> : vector<8x128xf32>
    %124 = tpu.matmul %86, %5, %cst_44 {dimension_numbers = #tpu.dot_dimension_numbers<[1], [0], [0], [1], [0, 0, 1, 1], [], []>} : vector<8x32xf32>, vector<32x128xf32>, vector<8x128xf32> -> vector<8x128xf32>
    %cst_45 = arith.constant dense<0.000000e+00> : vector<8x128xf32>
    %125 = tpu.matmul %28, %11, %cst_45 {dimension_numbers = #tpu.dot_dimension_numbers<[1], [0], [0], [1], [0, 0, 1, 1], [], []>} : vector<8x32xf32>, vector<32x128xf32>, vector<8x128xf32> -> vector<8x128xf32>
    %126 = arith.addf %124, %125 : vector<8x128xf32>
    %127 = arith.addf %126, %19 : vector<8x128xf32>
    %128 = arith.negf %127 : vector<8x128xf32>
    %129 = math.exp %128 : vector<8x128xf32>
    %cst_46 = arith.constant 1.000000e+00 : f32
    %130 = vector.broadcast %cst_46 : f32 to vector<8x128xf32>
    %131 = arith.addf %130, %129 : vector<8x128xf32>
    %132 = arith.divf %130, %131 : vector<8x128xf32>
    %133 = math.tanh %127 : vector<8x128xf32>
    %134 = vector.extract_strided_slice %132 {offsets = [0, 0], sizes = [8, 32], strides = [1, 1]} : vector<8x128xf32> to vector<8x32xf32>
    %135 = vector.extract_strided_slice %132 {offsets = [0, 32], sizes = [8, 32], strides = [1, 1]} : vector<8x128xf32> to vector<8x32xf32>
    %136 = vector.extract_strided_slice %133 {offsets = [0, 64], sizes = [8, 32], strides = [1, 1]} : vector<8x128xf32> to vector<8x32xf32>
    %137 = vector.extract_strided_slice %132 {offsets = [0, 96], sizes = [8, 32], strides = [1, 1]} : vector<8x128xf32> to vector<8x32xf32>
    %138 = arith.mulf %135, %31 : vector<8x32xf32>
    %139 = arith.mulf %134, %136 : vector<8x32xf32>
    %140 = arith.addf %138, %139 : vector<8x32xf32>
    %141 = math.tanh %140 : vector<8x32xf32>
    %142 = arith.mulf %137, %141 : vector<8x32xf32>
    %143 = vector.extract_strided_slice %25 {offsets = [24, 0], sizes = [8, 128], strides = [1, 1]} : vector<64x128xf32> to vector<8x128xf32>
    %cst_47 = arith.constant dense<0.000000e+00> : vector<8x128xf32>
    %144 = tpu.matmul %104, %7, %cst_47 {dimension_numbers = #tpu.dot_dimension_numbers<[1], [0], [0], [1], [0, 0, 1, 1], [], []>} : vector<8x32xf32>, vector<32x128xf32>, vector<8x128xf32> -> vector<8x128xf32>
    %145 = arith.addf %143, %144 : vector<8x128xf32>
    %146 = arith.negf %145 : vector<8x128xf32>
    %147 = math.exp %146 : vector<8x128xf32>
    %cst_48 = arith.constant 1.000000e+00 : f32
    %148 = vector.broadcast %cst_48 : f32 to vector<8x128xf32>
    %149 = arith.addf %148, %147 : vector<8x128xf32>
    %150 = arith.divf %148, %149 : vector<8x128xf32>
    %151 = math.tanh %145 : vector<8x128xf32>
    %152 = vector.extract_strided_slice %150 {offsets = [0, 0], sizes = [8, 32], strides = [1, 1]} : vector<8x128xf32> to vector<8x32xf32>
    %153 = vector.extract_strided_slice %150 {offsets = [0, 32], sizes = [8, 32], strides = [1, 1]} : vector<8x128xf32> to vector<8x32xf32>
    %154 = vector.extract_strided_slice %151 {offsets = [0, 64], sizes = [8, 32], strides = [1, 1]} : vector<8x128xf32> to vector<8x32xf32>
    %155 = vector.extract_strided_slice %150 {offsets = [0, 96], sizes = [8, 32], strides = [1, 1]} : vector<8x128xf32> to vector<8x32xf32>
    %156 = arith.mulf %153, %102 : vector<8x32xf32>
    %157 = arith.mulf %152, %154 : vector<8x32xf32>
    %158 = arith.addf %156, %157 : vector<8x32xf32>
    %159 = math.tanh %158 : vector<8x32xf32>
    %160 = arith.mulf %155, %159 : vector<8x32xf32>
    %cst_49 = arith.constant dense<0.000000e+00> : vector<8x128xf32>
    %161 = tpu.matmul %104, %3, %cst_49 {dimension_numbers = #tpu.dot_dimension_numbers<[1], [0], [0], [1], [0, 0, 1, 1], [], []>} : vector<8x32xf32>, vector<32x128xf32>, vector<8x128xf32> -> vector<8x128xf32>
    %cst_50 = arith.constant dense<0.000000e+00> : vector<8x128xf32>
    %162 = tpu.matmul %123, %9, %cst_50 {dimension_numbers = #tpu.dot_dimension_numbers<[1], [0], [0], [1], [0, 0, 1, 1], [], []>} : vector<8x32xf32>, vector<32x128xf32>, vector<8x128xf32> -> vector<8x128xf32>
    %163 = arith.addf %161, %162 : vector<8x128xf32>
    %164 = arith.addf %163, %15 : vector<8x128xf32>
    %165 = arith.negf %164 : vector<8x128xf32>
    %166 = math.exp %165 : vector<8x128xf32>
    %cst_51 = arith.constant 1.000000e+00 : f32
    %167 = vector.broadcast %cst_51 : f32 to vector<8x128xf32>
    %168 = arith.addf %167, %166 : vector<8x128xf32>
    %169 = arith.divf %167, %168 : vector<8x128xf32>
    %170 = math.tanh %164 : vector<8x128xf32>
    %171 = vector.extract_strided_slice %169 {offsets = [0, 0], sizes = [8, 32], strides = [1, 1]} : vector<8x128xf32> to vector<8x32xf32>
    %172 = vector.extract_strided_slice %169 {offsets = [0, 32], sizes = [8, 32], strides = [1, 1]} : vector<8x128xf32> to vector<8x32xf32>
    %173 = vector.extract_strided_slice %170 {offsets = [0, 64], sizes = [8, 32], strides = [1, 1]} : vector<8x128xf32> to vector<8x32xf32>
    %174 = vector.extract_strided_slice %169 {offsets = [0, 96], sizes = [8, 32], strides = [1, 1]} : vector<8x128xf32> to vector<8x32xf32>
    %175 = arith.mulf %172, %121 : vector<8x32xf32>
    %176 = arith.mulf %171, %173 : vector<8x32xf32>
    %177 = arith.addf %175, %176 : vector<8x32xf32>
    %178 = math.tanh %177 : vector<8x32xf32>
    %179 = arith.mulf %174, %178 : vector<8x32xf32>
    %cst_52 = arith.constant dense<0.000000e+00> : vector<8x128xf32>
    %180 = tpu.matmul %123, %5, %cst_52 {dimension_numbers = #tpu.dot_dimension_numbers<[1], [0], [0], [1], [0, 0, 1, 1], [], []>} : vector<8x32xf32>, vector<32x128xf32>, vector<8x128xf32> -> vector<8x128xf32>
    %cst_53 = arith.constant dense<0.000000e+00> : vector<8x128xf32>
    %181 = tpu.matmul %142, %11, %cst_53 {dimension_numbers = #tpu.dot_dimension_numbers<[1], [0], [0], [1], [0, 0, 1, 1], [], []>} : vector<8x32xf32>, vector<32x128xf32>, vector<8x128xf32> -> vector<8x128xf32>
    %182 = arith.addf %180, %181 : vector<8x128xf32>
    %183 = arith.addf %182, %19 : vector<8x128xf32>
    %184 = arith.negf %183 : vector<8x128xf32>
    %185 = math.exp %184 : vector<8x128xf32>
    %cst_54 = arith.constant 1.000000e+00 : f32
    %186 = vector.broadcast %cst_54 : f32 to vector<8x128xf32>
    %187 = arith.addf %186, %185 : vector<8x128xf32>
    %188 = arith.divf %186, %187 : vector<8x128xf32>
    %189 = math.tanh %183 : vector<8x128xf32>
    %190 = vector.extract_strided_slice %188 {offsets = [0, 0], sizes = [8, 32], strides = [1, 1]} : vector<8x128xf32> to vector<8x32xf32>
    %191 = vector.extract_strided_slice %188 {offsets = [0, 32], sizes = [8, 32], strides = [1, 1]} : vector<8x128xf32> to vector<8x32xf32>
    %192 = vector.extract_strided_slice %189 {offsets = [0, 64], sizes = [8, 32], strides = [1, 1]} : vector<8x128xf32> to vector<8x32xf32>
    %193 = vector.extract_strided_slice %188 {offsets = [0, 96], sizes = [8, 32], strides = [1, 1]} : vector<8x128xf32> to vector<8x32xf32>
    %194 = arith.mulf %191, %140 : vector<8x32xf32>
    %195 = arith.mulf %190, %192 : vector<8x32xf32>
    %196 = arith.addf %194, %195 : vector<8x32xf32>
    %197 = math.tanh %196 : vector<8x32xf32>
    %198 = arith.mulf %193, %197 : vector<8x32xf32>
    %199 = vector.extract_strided_slice %25 {offsets = [32, 0], sizes = [8, 128], strides = [1, 1]} : vector<64x128xf32> to vector<8x128xf32>
    %cst_55 = arith.constant dense<0.000000e+00> : vector<8x128xf32>
    %200 = tpu.matmul %160, %7, %cst_55 {dimension_numbers = #tpu.dot_dimension_numbers<[1], [0], [0], [1], [0, 0, 1, 1], [], []>} : vector<8x32xf32>, vector<32x128xf32>, vector<8x128xf32> -> vector<8x128xf32>
    %201 = arith.addf %199, %200 : vector<8x128xf32>
    %202 = arith.negf %201 : vector<8x128xf32>
    %203 = math.exp %202 : vector<8x128xf32>
    %cst_56 = arith.constant 1.000000e+00 : f32
    %204 = vector.broadcast %cst_56 : f32 to vector<8x128xf32>
    %205 = arith.addf %204, %203 : vector<8x128xf32>
    %206 = arith.divf %204, %205 : vector<8x128xf32>
    %207 = math.tanh %201 : vector<8x128xf32>
    %208 = vector.extract_strided_slice %206 {offsets = [0, 0], sizes = [8, 32], strides = [1, 1]} : vector<8x128xf32> to vector<8x32xf32>
    %209 = vector.extract_strided_slice %206 {offsets = [0, 32], sizes = [8, 32], strides = [1, 1]} : vector<8x128xf32> to vector<8x32xf32>
    %210 = vector.extract_strided_slice %207 {offsets = [0, 64], sizes = [8, 32], strides = [1, 1]} : vector<8x128xf32> to vector<8x32xf32>
    %211 = vector.extract_strided_slice %206 {offsets = [0, 96], sizes = [8, 32], strides = [1, 1]} : vector<8x128xf32> to vector<8x32xf32>
    %212 = arith.mulf %209, %158 : vector<8x32xf32>
    %213 = arith.mulf %208, %210 : vector<8x32xf32>
    %214 = arith.addf %212, %213 : vector<8x32xf32>
    %215 = math.tanh %214 : vector<8x32xf32>
    %216 = arith.mulf %211, %215 : vector<8x32xf32>
    %cst_57 = arith.constant dense<0.000000e+00> : vector<8x128xf32>
    %217 = tpu.matmul %160, %3, %cst_57 {dimension_numbers = #tpu.dot_dimension_numbers<[1], [0], [0], [1], [0, 0, 1, 1], [], []>} : vector<8x32xf32>, vector<32x128xf32>, vector<8x128xf32> -> vector<8x128xf32>
    %cst_58 = arith.constant dense<0.000000e+00> : vector<8x128xf32>
    %218 = tpu.matmul %179, %9, %cst_58 {dimension_numbers = #tpu.dot_dimension_numbers<[1], [0], [0], [1], [0, 0, 1, 1], [], []>} : vector<8x32xf32>, vector<32x128xf32>, vector<8x128xf32> -> vector<8x128xf32>
    %219 = arith.addf %217, %218 : vector<8x128xf32>
    %220 = arith.addf %219, %15 : vector<8x128xf32>
    %221 = arith.negf %220 : vector<8x128xf32>
    %222 = math.exp %221 : vector<8x128xf32>
    %cst_59 = arith.constant 1.000000e+00 : f32
    %223 = vector.broadcast %cst_59 : f32 to vector<8x128xf32>
    %224 = arith.addf %223, %222 : vector<8x128xf32>
    %225 = arith.divf %223, %224 : vector<8x128xf32>
    %226 = math.tanh %220 : vector<8x128xf32>
    %227 = vector.extract_strided_slice %225 {offsets = [0, 0], sizes = [8, 32], strides = [1, 1]} : vector<8x128xf32> to vector<8x32xf32>
    %228 = vector.extract_strided_slice %225 {offsets = [0, 32], sizes = [8, 32], strides = [1, 1]} : vector<8x128xf32> to vector<8x32xf32>
    %229 = vector.extract_strided_slice %226 {offsets = [0, 64], sizes = [8, 32], strides = [1, 1]} : vector<8x128xf32> to vector<8x32xf32>
    %230 = vector.extract_strided_slice %225 {offsets = [0, 96], sizes = [8, 32], strides = [1, 1]} : vector<8x128xf32> to vector<8x32xf32>
    %231 = arith.mulf %228, %177 : vector<8x32xf32>
    %232 = arith.mulf %227, %229 : vector<8x32xf32>
    %233 = arith.addf %231, %232 : vector<8x32xf32>
    %234 = math.tanh %233 : vector<8x32xf32>
    %235 = arith.mulf %230, %234 : vector<8x32xf32>
    %cst_60 = arith.constant dense<0.000000e+00> : vector<8x128xf32>
    %236 = tpu.matmul %179, %5, %cst_60 {dimension_numbers = #tpu.dot_dimension_numbers<[1], [0], [0], [1], [0, 0, 1, 1], [], []>} : vector<8x32xf32>, vector<32x128xf32>, vector<8x128xf32> -> vector<8x128xf32>
    %cst_61 = arith.constant dense<0.000000e+00> : vector<8x128xf32>
    %237 = tpu.matmul %198, %11, %cst_61 {dimension_numbers = #tpu.dot_dimension_numbers<[1], [0], [0], [1], [0, 0, 1, 1], [], []>} : vector<8x32xf32>, vector<32x128xf32>, vector<8x128xf32> -> vector<8x128xf32>
    %238 = arith.addf %236, %237 : vector<8x128xf32>
    %239 = arith.addf %238, %19 : vector<8x128xf32>
    %240 = arith.negf %239 : vector<8x128xf32>
    %241 = math.exp %240 : vector<8x128xf32>
    %cst_62 = arith.constant 1.000000e+00 : f32
    %242 = vector.broadcast %cst_62 : f32 to vector<8x128xf32>
    %243 = arith.addf %242, %241 : vector<8x128xf32>
    %244 = arith.divf %242, %243 : vector<8x128xf32>
    %245 = math.tanh %239 : vector<8x128xf32>
    %246 = vector.extract_strided_slice %244 {offsets = [0, 0], sizes = [8, 32], strides = [1, 1]} : vector<8x128xf32> to vector<8x32xf32>
    %247 = vector.extract_strided_slice %244 {offsets = [0, 32], sizes = [8, 32], strides = [1, 1]} : vector<8x128xf32> to vector<8x32xf32>
    %248 = vector.extract_strided_slice %245 {offsets = [0, 64], sizes = [8, 32], strides = [1, 1]} : vector<8x128xf32> to vector<8x32xf32>
    %249 = vector.extract_strided_slice %244 {offsets = [0, 96], sizes = [8, 32], strides = [1, 1]} : vector<8x128xf32> to vector<8x32xf32>
    %250 = arith.mulf %247, %196 : vector<8x32xf32>
    %251 = arith.mulf %246, %248 : vector<8x32xf32>
    %252 = arith.addf %250, %251 : vector<8x32xf32>
    %253 = math.tanh %252 : vector<8x32xf32>
    %254 = arith.mulf %249, %253 : vector<8x32xf32>
    %255 = vector.extract_strided_slice %25 {offsets = [40, 0], sizes = [8, 128], strides = [1, 1]} : vector<64x128xf32> to vector<8x128xf32>
    %cst_63 = arith.constant dense<0.000000e+00> : vector<8x128xf32>
    %256 = tpu.matmul %216, %7, %cst_63 {dimension_numbers = #tpu.dot_dimension_numbers<[1], [0], [0], [1], [0, 0, 1, 1], [], []>} : vector<8x32xf32>, vector<32x128xf32>, vector<8x128xf32> -> vector<8x128xf32>
    %257 = arith.addf %255, %256 : vector<8x128xf32>
    %258 = arith.negf %257 : vector<8x128xf32>
    %259 = math.exp %258 : vector<8x128xf32>
    %cst_64 = arith.constant 1.000000e+00 : f32
    %260 = vector.broadcast %cst_64 : f32 to vector<8x128xf32>
    %261 = arith.addf %260, %259 : vector<8x128xf32>
    %262 = arith.divf %260, %261 : vector<8x128xf32>
    %263 = math.tanh %257 : vector<8x128xf32>
    %264 = vector.extract_strided_slice %262 {offsets = [0, 0], sizes = [8, 32], strides = [1, 1]} : vector<8x128xf32> to vector<8x32xf32>
    %265 = vector.extract_strided_slice %262 {offsets = [0, 32], sizes = [8, 32], strides = [1, 1]} : vector<8x128xf32> to vector<8x32xf32>
    %266 = vector.extract_strided_slice %263 {offsets = [0, 64], sizes = [8, 32], strides = [1, 1]} : vector<8x128xf32> to vector<8x32xf32>
    %267 = vector.extract_strided_slice %262 {offsets = [0, 96], sizes = [8, 32], strides = [1, 1]} : vector<8x128xf32> to vector<8x32xf32>
    %268 = arith.mulf %265, %214 : vector<8x32xf32>
    %269 = arith.mulf %264, %266 : vector<8x32xf32>
    %270 = arith.addf %268, %269 : vector<8x32xf32>
    %271 = math.tanh %270 : vector<8x32xf32>
    %272 = arith.mulf %267, %271 : vector<8x32xf32>
    %cst_65 = arith.constant dense<0.000000e+00> : vector<8x128xf32>
    %273 = tpu.matmul %216, %3, %cst_65 {dimension_numbers = #tpu.dot_dimension_numbers<[1], [0], [0], [1], [0, 0, 1, 1], [], []>} : vector<8x32xf32>, vector<32x128xf32>, vector<8x128xf32> -> vector<8x128xf32>
    %cst_66 = arith.constant dense<0.000000e+00> : vector<8x128xf32>
    %274 = tpu.matmul %235, %9, %cst_66 {dimension_numbers = #tpu.dot_dimension_numbers<[1], [0], [0], [1], [0, 0, 1, 1], [], []>} : vector<8x32xf32>, vector<32x128xf32>, vector<8x128xf32> -> vector<8x128xf32>
    %275 = arith.addf %273, %274 : vector<8x128xf32>
    %276 = arith.addf %275, %15 : vector<8x128xf32>
    %277 = arith.negf %276 : vector<8x128xf32>
    %278 = math.exp %277 : vector<8x128xf32>
    %cst_67 = arith.constant 1.000000e+00 : f32
    %279 = vector.broadcast %cst_67 : f32 to vector<8x128xf32>
    %280 = arith.addf %279, %278 : vector<8x128xf32>
    %281 = arith.divf %279, %280 : vector<8x128xf32>
    %282 = math.tanh %276 : vector<8x128xf32>
    %283 = vector.extract_strided_slice %281 {offsets = [0, 0], sizes = [8, 32], strides = [1, 1]} : vector<8x128xf32> to vector<8x32xf32>
    %284 = vector.extract_strided_slice %281 {offsets = [0, 32], sizes = [8, 32], strides = [1, 1]} : vector<8x128xf32> to vector<8x32xf32>
    %285 = vector.extract_strided_slice %282 {offsets = [0, 64], sizes = [8, 32], strides = [1, 1]} : vector<8x128xf32> to vector<8x32xf32>
    %286 = vector.extract_strided_slice %281 {offsets = [0, 96], sizes = [8, 32], strides = [1, 1]} : vector<8x128xf32> to vector<8x32xf32>
    %287 = arith.mulf %284, %233 : vector<8x32xf32>
    %288 = arith.mulf %283, %285 : vector<8x32xf32>
    %289 = arith.addf %287, %288 : vector<8x32xf32>
    %290 = math.tanh %289 : vector<8x32xf32>
    %291 = arith.mulf %286, %290 : vector<8x32xf32>
    %cst_68 = arith.constant dense<0.000000e+00> : vector<8x128xf32>
    %292 = tpu.matmul %235, %5, %cst_68 {dimension_numbers = #tpu.dot_dimension_numbers<[1], [0], [0], [1], [0, 0, 1, 1], [], []>} : vector<8x32xf32>, vector<32x128xf32>, vector<8x128xf32> -> vector<8x128xf32>
    %cst_69 = arith.constant dense<0.000000e+00> : vector<8x128xf32>
    %293 = tpu.matmul %254, %11, %cst_69 {dimension_numbers = #tpu.dot_dimension_numbers<[1], [0], [0], [1], [0, 0, 1, 1], [], []>} : vector<8x32xf32>, vector<32x128xf32>, vector<8x128xf32> -> vector<8x128xf32>
    %294 = arith.addf %292, %293 : vector<8x128xf32>
    %295 = arith.addf %294, %19 : vector<8x128xf32>
    %296 = arith.negf %295 : vector<8x128xf32>
    %297 = math.exp %296 : vector<8x128xf32>
    %cst_70 = arith.constant 1.000000e+00 : f32
    %298 = vector.broadcast %cst_70 : f32 to vector<8x128xf32>
    %299 = arith.addf %298, %297 : vector<8x128xf32>
    %300 = arith.divf %298, %299 : vector<8x128xf32>
    %301 = math.tanh %295 : vector<8x128xf32>
    %302 = vector.extract_strided_slice %300 {offsets = [0, 0], sizes = [8, 32], strides = [1, 1]} : vector<8x128xf32> to vector<8x32xf32>
    %303 = vector.extract_strided_slice %300 {offsets = [0, 32], sizes = [8, 32], strides = [1, 1]} : vector<8x128xf32> to vector<8x32xf32>
    %304 = vector.extract_strided_slice %301 {offsets = [0, 64], sizes = [8, 32], strides = [1, 1]} : vector<8x128xf32> to vector<8x32xf32>
    %305 = vector.extract_strided_slice %300 {offsets = [0, 96], sizes = [8, 32], strides = [1, 1]} : vector<8x128xf32> to vector<8x32xf32>
    %306 = arith.mulf %303, %252 : vector<8x32xf32>
    %307 = arith.mulf %302, %304 : vector<8x32xf32>
    %308 = arith.addf %306, %307 : vector<8x32xf32>
    %309 = math.tanh %308 : vector<8x32xf32>
    %310 = arith.mulf %305, %309 : vector<8x32xf32>
    %311 = vector.extract_strided_slice %25 {offsets = [48, 0], sizes = [8, 128], strides = [1, 1]} : vector<64x128xf32> to vector<8x128xf32>
    %cst_71 = arith.constant dense<0.000000e+00> : vector<8x128xf32>
    %312 = tpu.matmul %272, %7, %cst_71 {dimension_numbers = #tpu.dot_dimension_numbers<[1], [0], [0], [1], [0, 0, 1, 1], [], []>} : vector<8x32xf32>, vector<32x128xf32>, vector<8x128xf32> -> vector<8x128xf32>
    %313 = arith.addf %311, %312 : vector<8x128xf32>
    %314 = arith.negf %313 : vector<8x128xf32>
    %315 = math.exp %314 : vector<8x128xf32>
    %cst_72 = arith.constant 1.000000e+00 : f32
    %316 = vector.broadcast %cst_72 : f32 to vector<8x128xf32>
    %317 = arith.addf %316, %315 : vector<8x128xf32>
    %318 = arith.divf %316, %317 : vector<8x128xf32>
    %319 = math.tanh %313 : vector<8x128xf32>
    %320 = vector.extract_strided_slice %318 {offsets = [0, 0], sizes = [8, 32], strides = [1, 1]} : vector<8x128xf32> to vector<8x32xf32>
    %321 = vector.extract_strided_slice %318 {offsets = [0, 32], sizes = [8, 32], strides = [1, 1]} : vector<8x128xf32> to vector<8x32xf32>
    %322 = vector.extract_strided_slice %319 {offsets = [0, 64], sizes = [8, 32], strides = [1, 1]} : vector<8x128xf32> to vector<8x32xf32>
    %323 = vector.extract_strided_slice %318 {offsets = [0, 96], sizes = [8, 32], strides = [1, 1]} : vector<8x128xf32> to vector<8x32xf32>
    %324 = arith.mulf %321, %270 : vector<8x32xf32>
    %325 = arith.mulf %320, %322 : vector<8x32xf32>
    %326 = arith.addf %324, %325 : vector<8x32xf32>
    %327 = math.tanh %326 : vector<8x32xf32>
    %328 = arith.mulf %323, %327 : vector<8x32xf32>
    %cst_73 = arith.constant dense<0.000000e+00> : vector<8x128xf32>
    %329 = tpu.matmul %272, %3, %cst_73 {dimension_numbers = #tpu.dot_dimension_numbers<[1], [0], [0], [1], [0, 0, 1, 1], [], []>} : vector<8x32xf32>, vector<32x128xf32>, vector<8x128xf32> -> vector<8x128xf32>
    %cst_74 = arith.constant dense<0.000000e+00> : vector<8x128xf32>
    %330 = tpu.matmul %291, %9, %cst_74 {dimension_numbers = #tpu.dot_dimension_numbers<[1], [0], [0], [1], [0, 0, 1, 1], [], []>} : vector<8x32xf32>, vector<32x128xf32>, vector<8x128xf32> -> vector<8x128xf32>
    %331 = arith.addf %329, %330 : vector<8x128xf32>
    %332 = arith.addf %331, %15 : vector<8x128xf32>
    %333 = arith.negf %332 : vector<8x128xf32>
    %334 = math.exp %333 : vector<8x128xf32>
    %cst_75 = arith.constant 1.000000e+00 : f32
    %335 = vector.broadcast %cst_75 : f32 to vector<8x128xf32>
    %336 = arith.addf %335, %334 : vector<8x128xf32>
    %337 = arith.divf %335, %336 : vector<8x128xf32>
    %338 = math.tanh %332 : vector<8x128xf32>
    %339 = vector.extract_strided_slice %337 {offsets = [0, 0], sizes = [8, 32], strides = [1, 1]} : vector<8x128xf32> to vector<8x32xf32>
    %340 = vector.extract_strided_slice %337 {offsets = [0, 32], sizes = [8, 32], strides = [1, 1]} : vector<8x128xf32> to vector<8x32xf32>
    %341 = vector.extract_strided_slice %338 {offsets = [0, 64], sizes = [8, 32], strides = [1, 1]} : vector<8x128xf32> to vector<8x32xf32>
    %342 = vector.extract_strided_slice %337 {offsets = [0, 96], sizes = [8, 32], strides = [1, 1]} : vector<8x128xf32> to vector<8x32xf32>
    %343 = arith.mulf %340, %289 : vector<8x32xf32>
    %344 = arith.mulf %339, %341 : vector<8x32xf32>
    %345 = arith.addf %343, %344 : vector<8x32xf32>
    %346 = math.tanh %345 : vector<8x32xf32>
    %347 = arith.mulf %342, %346 : vector<8x32xf32>
    %cst_76 = arith.constant dense<0.000000e+00> : vector<8x128xf32>
    %348 = tpu.matmul %291, %5, %cst_76 {dimension_numbers = #tpu.dot_dimension_numbers<[1], [0], [0], [1], [0, 0, 1, 1], [], []>} : vector<8x32xf32>, vector<32x128xf32>, vector<8x128xf32> -> vector<8x128xf32>
    %cst_77 = arith.constant dense<0.000000e+00> : vector<8x128xf32>
    %349 = tpu.matmul %310, %11, %cst_77 {dimension_numbers = #tpu.dot_dimension_numbers<[1], [0], [0], [1], [0, 0, 1, 1], [], []>} : vector<8x32xf32>, vector<32x128xf32>, vector<8x128xf32> -> vector<8x128xf32>
    %350 = arith.addf %348, %349 : vector<8x128xf32>
    %351 = arith.addf %350, %19 : vector<8x128xf32>
    %352 = arith.negf %351 : vector<8x128xf32>
    %353 = math.exp %352 : vector<8x128xf32>
    %cst_78 = arith.constant 1.000000e+00 : f32
    %354 = vector.broadcast %cst_78 : f32 to vector<8x128xf32>
    %355 = arith.addf %354, %353 : vector<8x128xf32>
    %356 = arith.divf %354, %355 : vector<8x128xf32>
    %357 = math.tanh %351 : vector<8x128xf32>
    %358 = vector.extract_strided_slice %356 {offsets = [0, 0], sizes = [8, 32], strides = [1, 1]} : vector<8x128xf32> to vector<8x32xf32>
    %359 = vector.extract_strided_slice %356 {offsets = [0, 32], sizes = [8, 32], strides = [1, 1]} : vector<8x128xf32> to vector<8x32xf32>
    %360 = vector.extract_strided_slice %357 {offsets = [0, 64], sizes = [8, 32], strides = [1, 1]} : vector<8x128xf32> to vector<8x32xf32>
    %361 = vector.extract_strided_slice %356 {offsets = [0, 96], sizes = [8, 32], strides = [1, 1]} : vector<8x128xf32> to vector<8x32xf32>
    %362 = arith.mulf %359, %308 : vector<8x32xf32>
    %363 = arith.mulf %358, %360 : vector<8x32xf32>
    %364 = arith.addf %362, %363 : vector<8x32xf32>
    %365 = math.tanh %364 : vector<8x32xf32>
    %366 = arith.mulf %361, %365 : vector<8x32xf32>
    %367 = vector.extract_strided_slice %25 {offsets = [56, 0], sizes = [8, 128], strides = [1, 1]} : vector<64x128xf32> to vector<8x128xf32>
    %cst_79 = arith.constant dense<0.000000e+00> : vector<8x128xf32>
    %368 = tpu.matmul %328, %7, %cst_79 {dimension_numbers = #tpu.dot_dimension_numbers<[1], [0], [0], [1], [0, 0, 1, 1], [], []>} : vector<8x32xf32>, vector<32x128xf32>, vector<8x128xf32> -> vector<8x128xf32>
    %369 = arith.addf %367, %368 : vector<8x128xf32>
    %370 = arith.negf %369 : vector<8x128xf32>
    %371 = math.exp %370 : vector<8x128xf32>
    %cst_80 = arith.constant 1.000000e+00 : f32
    %372 = vector.broadcast %cst_80 : f32 to vector<8x128xf32>
    %373 = arith.addf %372, %371 : vector<8x128xf32>
    %374 = arith.divf %372, %373 : vector<8x128xf32>
    %375 = math.tanh %369 : vector<8x128xf32>
    %376 = vector.extract_strided_slice %374 {offsets = [0, 0], sizes = [8, 32], strides = [1, 1]} : vector<8x128xf32> to vector<8x32xf32>
    %377 = vector.extract_strided_slice %374 {offsets = [0, 32], sizes = [8, 32], strides = [1, 1]} : vector<8x128xf32> to vector<8x32xf32>
    %378 = vector.extract_strided_slice %375 {offsets = [0, 64], sizes = [8, 32], strides = [1, 1]} : vector<8x128xf32> to vector<8x32xf32>
    %379 = vector.extract_strided_slice %374 {offsets = [0, 96], sizes = [8, 32], strides = [1, 1]} : vector<8x128xf32> to vector<8x32xf32>
    %380 = arith.mulf %377, %326 : vector<8x32xf32>
    %381 = arith.mulf %376, %378 : vector<8x32xf32>
    %382 = arith.addf %380, %381 : vector<8x32xf32>
    %383 = math.tanh %382 : vector<8x32xf32>
    %384 = arith.mulf %379, %383 : vector<8x32xf32>
    %cst_81 = arith.constant dense<0.000000e+00> : vector<8x128xf32>
    %385 = tpu.matmul %328, %3, %cst_81 {dimension_numbers = #tpu.dot_dimension_numbers<[1], [0], [0], [1], [0, 0, 1, 1], [], []>} : vector<8x32xf32>, vector<32x128xf32>, vector<8x128xf32> -> vector<8x128xf32>
    %cst_82 = arith.constant dense<0.000000e+00> : vector<8x128xf32>
    %386 = tpu.matmul %347, %9, %cst_82 {dimension_numbers = #tpu.dot_dimension_numbers<[1], [0], [0], [1], [0, 0, 1, 1], [], []>} : vector<8x32xf32>, vector<32x128xf32>, vector<8x128xf32> -> vector<8x128xf32>
    %387 = arith.addf %385, %386 : vector<8x128xf32>
    %388 = arith.addf %387, %15 : vector<8x128xf32>
    %389 = arith.negf %388 : vector<8x128xf32>
    %390 = math.exp %389 : vector<8x128xf32>
    %cst_83 = arith.constant 1.000000e+00 : f32
    %391 = vector.broadcast %cst_83 : f32 to vector<8x128xf32>
    %392 = arith.addf %391, %390 : vector<8x128xf32>
    %393 = arith.divf %391, %392 : vector<8x128xf32>
    %394 = math.tanh %388 : vector<8x128xf32>
    %395 = vector.extract_strided_slice %393 {offsets = [0, 0], sizes = [8, 32], strides = [1, 1]} : vector<8x128xf32> to vector<8x32xf32>
    %396 = vector.extract_strided_slice %393 {offsets = [0, 32], sizes = [8, 32], strides = [1, 1]} : vector<8x128xf32> to vector<8x32xf32>
    %397 = vector.extract_strided_slice %394 {offsets = [0, 64], sizes = [8, 32], strides = [1, 1]} : vector<8x128xf32> to vector<8x32xf32>
    %398 = vector.extract_strided_slice %393 {offsets = [0, 96], sizes = [8, 32], strides = [1, 1]} : vector<8x128xf32> to vector<8x32xf32>
    %399 = arith.mulf %396, %345 : vector<8x32xf32>
    %400 = arith.mulf %395, %397 : vector<8x32xf32>
    %401 = arith.addf %399, %400 : vector<8x32xf32>
    %402 = math.tanh %401 : vector<8x32xf32>
    %403 = arith.mulf %398, %402 : vector<8x32xf32>
    %cst_84 = arith.constant dense<0.000000e+00> : vector<8x128xf32>
    %404 = tpu.matmul %347, %5, %cst_84 {dimension_numbers = #tpu.dot_dimension_numbers<[1], [0], [0], [1], [0, 0, 1, 1], [], []>} : vector<8x32xf32>, vector<32x128xf32>, vector<8x128xf32> -> vector<8x128xf32>
    %cst_85 = arith.constant dense<0.000000e+00> : vector<8x128xf32>
    %405 = tpu.matmul %366, %11, %cst_85 {dimension_numbers = #tpu.dot_dimension_numbers<[1], [0], [0], [1], [0, 0, 1, 1], [], []>} : vector<8x32xf32>, vector<32x128xf32>, vector<8x128xf32> -> vector<8x128xf32>
    %406 = arith.addf %404, %405 : vector<8x128xf32>
    %407 = arith.addf %406, %19 : vector<8x128xf32>
    %408 = arith.negf %407 : vector<8x128xf32>
    %409 = math.exp %408 : vector<8x128xf32>
    %cst_86 = arith.constant 1.000000e+00 : f32
    %410 = vector.broadcast %cst_86 : f32 to vector<8x128xf32>
    %411 = arith.addf %410, %409 : vector<8x128xf32>
    %412 = arith.divf %410, %411 : vector<8x128xf32>
    %413 = math.tanh %407 : vector<8x128xf32>
    %414 = vector.extract_strided_slice %412 {offsets = [0, 0], sizes = [8, 32], strides = [1, 1]} : vector<8x128xf32> to vector<8x32xf32>
    %415 = vector.extract_strided_slice %412 {offsets = [0, 32], sizes = [8, 32], strides = [1, 1]} : vector<8x128xf32> to vector<8x32xf32>
    %416 = vector.extract_strided_slice %413 {offsets = [0, 64], sizes = [8, 32], strides = [1, 1]} : vector<8x128xf32> to vector<8x32xf32>
    %417 = vector.extract_strided_slice %412 {offsets = [0, 96], sizes = [8, 32], strides = [1, 1]} : vector<8x128xf32> to vector<8x32xf32>
    %418 = arith.mulf %415, %364 : vector<8x32xf32>
    %419 = arith.mulf %414, %416 : vector<8x32xf32>
    %420 = arith.addf %418, %419 : vector<8x32xf32>
    %421 = math.tanh %420 : vector<8x32xf32>
    %422 = arith.mulf %417, %421 : vector<8x32xf32>
    %cst_87 = arith.constant dense<0.000000e+00> : vector<8x128xf32>
    %423 = tpu.matmul %384, %3, %cst_87 {dimension_numbers = #tpu.dot_dimension_numbers<[1], [0], [0], [1], [0, 0, 1, 1], [], []>} : vector<8x32xf32>, vector<32x128xf32>, vector<8x128xf32> -> vector<8x128xf32>
    %cst_88 = arith.constant dense<0.000000e+00> : vector<8x128xf32>
    %424 = tpu.matmul %403, %9, %cst_88 {dimension_numbers = #tpu.dot_dimension_numbers<[1], [0], [0], [1], [0, 0, 1, 1], [], []>} : vector<8x32xf32>, vector<32x128xf32>, vector<8x128xf32> -> vector<8x128xf32>
    %425 = arith.addf %423, %424 : vector<8x128xf32>
    %426 = arith.addf %425, %15 : vector<8x128xf32>
    %427 = arith.negf %426 : vector<8x128xf32>
    %428 = math.exp %427 : vector<8x128xf32>
    %cst_89 = arith.constant 1.000000e+00 : f32
    %429 = vector.broadcast %cst_89 : f32 to vector<8x128xf32>
    %430 = arith.addf %429, %428 : vector<8x128xf32>
    %431 = arith.divf %429, %430 : vector<8x128xf32>
    %432 = math.tanh %426 : vector<8x128xf32>
    %433 = vector.extract_strided_slice %431 {offsets = [0, 0], sizes = [8, 32], strides = [1, 1]} : vector<8x128xf32> to vector<8x32xf32>
    %434 = vector.extract_strided_slice %431 {offsets = [0, 32], sizes = [8, 32], strides = [1, 1]} : vector<8x128xf32> to vector<8x32xf32>
    %435 = vector.extract_strided_slice %432 {offsets = [0, 64], sizes = [8, 32], strides = [1, 1]} : vector<8x128xf32> to vector<8x32xf32>
    %436 = vector.extract_strided_slice %431 {offsets = [0, 96], sizes = [8, 32], strides = [1, 1]} : vector<8x128xf32> to vector<8x32xf32>
    %437 = arith.mulf %434, %401 : vector<8x32xf32>
    %438 = arith.mulf %433, %435 : vector<8x32xf32>
    %439 = arith.addf %437, %438 : vector<8x32xf32>
    %440 = math.tanh %439 : vector<8x32xf32>
    %441 = arith.mulf %436, %440 : vector<8x32xf32>
    %cst_90 = arith.constant dense<0.000000e+00> : vector<8x128xf32>
    %442 = tpu.matmul %403, %5, %cst_90 {dimension_numbers = #tpu.dot_dimension_numbers<[1], [0], [0], [1], [0, 0, 1, 1], [], []>} : vector<8x32xf32>, vector<32x128xf32>, vector<8x128xf32> -> vector<8x128xf32>
    %cst_91 = arith.constant dense<0.000000e+00> : vector<8x128xf32>
    %443 = tpu.matmul %422, %11, %cst_91 {dimension_numbers = #tpu.dot_dimension_numbers<[1], [0], [0], [1], [0, 0, 1, 1], [], []>} : vector<8x32xf32>, vector<32x128xf32>, vector<8x128xf32> -> vector<8x128xf32>
    %444 = arith.addf %442, %443 : vector<8x128xf32>
    %445 = arith.addf %444, %19 : vector<8x128xf32>
    %446 = arith.negf %445 : vector<8x128xf32>
    %447 = math.exp %446 : vector<8x128xf32>
    %cst_92 = arith.constant 1.000000e+00 : f32
    %448 = vector.broadcast %cst_92 : f32 to vector<8x128xf32>
    %449 = arith.addf %448, %447 : vector<8x128xf32>
    %450 = arith.divf %448, %449 : vector<8x128xf32>
    %451 = math.tanh %445 : vector<8x128xf32>
    %452 = vector.extract_strided_slice %450 {offsets = [0, 0], sizes = [8, 32], strides = [1, 1]} : vector<8x128xf32> to vector<8x32xf32>
    %453 = vector.extract_strided_slice %450 {offsets = [0, 32], sizes = [8, 32], strides = [1, 1]} : vector<8x128xf32> to vector<8x32xf32>
    %454 = vector.extract_strided_slice %451 {offsets = [0, 64], sizes = [8, 32], strides = [1, 1]} : vector<8x128xf32> to vector<8x32xf32>
    %455 = vector.extract_strided_slice %450 {offsets = [0, 96], sizes = [8, 32], strides = [1, 1]} : vector<8x128xf32> to vector<8x32xf32>
    %456 = arith.mulf %453, %420 : vector<8x32xf32>
    %457 = arith.mulf %452, %454 : vector<8x32xf32>
    %458 = arith.addf %456, %457 : vector<8x32xf32>
    %459 = math.tanh %458 : vector<8x32xf32>
    %460 = arith.mulf %455, %459 : vector<8x32xf32>
    %cst_93 = arith.constant dense<0.000000e+00> : vector<8x128xf32>
    %461 = tpu.matmul %441, %5, %cst_93 {dimension_numbers = #tpu.dot_dimension_numbers<[1], [0], [0], [1], [0, 0, 1, 1], [], []>} : vector<8x32xf32>, vector<32x128xf32>, vector<8x128xf32> -> vector<8x128xf32>
    %cst_94 = arith.constant dense<0.000000e+00> : vector<8x128xf32>
    %462 = tpu.matmul %460, %11, %cst_94 {dimension_numbers = #tpu.dot_dimension_numbers<[1], [0], [0], [1], [0, 0, 1, 1], [], []>} : vector<8x32xf32>, vector<32x128xf32>, vector<8x128xf32> -> vector<8x128xf32>
    %463 = arith.addf %461, %462 : vector<8x128xf32>
    %464 = arith.addf %463, %19 : vector<8x128xf32>
    %465 = arith.negf %464 : vector<8x128xf32>
    %466 = math.exp %465 : vector<8x128xf32>
    %cst_95 = arith.constant 1.000000e+00 : f32
    %467 = vector.broadcast %cst_95 : f32 to vector<8x128xf32>
    %468 = arith.addf %467, %466 : vector<8x128xf32>
    %469 = arith.divf %467, %468 : vector<8x128xf32>
    %470 = math.tanh %464 : vector<8x128xf32>
    %471 = vector.extract_strided_slice %469 {offsets = [0, 0], sizes = [8, 32], strides = [1, 1]} : vector<8x128xf32> to vector<8x32xf32>
    %472 = vector.extract_strided_slice %469 {offsets = [0, 32], sizes = [8, 32], strides = [1, 1]} : vector<8x128xf32> to vector<8x32xf32>
    %473 = vector.extract_strided_slice %470 {offsets = [0, 64], sizes = [8, 32], strides = [1, 1]} : vector<8x128xf32> to vector<8x32xf32>
    %474 = vector.extract_strided_slice %469 {offsets = [0, 96], sizes = [8, 32], strides = [1, 1]} : vector<8x128xf32> to vector<8x32xf32>
    %475 = arith.mulf %472, %458 : vector<8x32xf32>
    %476 = arith.mulf %471, %473 : vector<8x32xf32>
    %477 = arith.addf %475, %476 : vector<8x32xf32>
    %478 = math.tanh %477 : vector<8x32xf32>
    %479 = arith.mulf %474, %478 : vector<8x32xf32>
    %c0_96 = arith.constant 0 : index
    %c0_97 = arith.constant 0 : index
    %480 = vector.load %arg4[%c0_96, %c0_97] : memref<32x128xf32, #tpu.memory_space<vmem>>, vector<32x128xf32>
    %cst_98 = arith.constant dense<0.000000e+00> : vector<8x128xf32>
    %481 = tpu.matmul %479, %480, %cst_98 {dimension_numbers = #tpu.dot_dimension_numbers<[1], [0], [0], [1], [0, 0, 1, 1], [], []>} : vector<8x32xf32>, vector<32x128xf32>, vector<8x128xf32> -> vector<8x128xf32>
    %c0_99 = arith.constant 0 : index
    %c0_100 = arith.constant 0 : index
    %482 = vector.load %arg5[%c0_99, %c0_100] : memref<1x128xf32, #tpu.memory_space<vmem>>, vector<1x128xf32>
    %483 = vector.broadcast %482 : vector<1x128xf32> to vector<8x128xf32>
    %484 = arith.addf %481, %483 : vector<8x128xf32>
    %cst_101 = arith.constant 0.000000e+00 : f32
    %485 = vector.broadcast %cst_101 : f32 to vector<8x128xf32>
    %486 = arith.maximumf %484, %485 : vector<8x128xf32>
    %c0_102 = arith.constant 0 : index
    %c0_103 = arith.constant 0 : index
    %487 = vector.load %arg6[%c0_102, %c0_103] : memref<128x128xf32, #tpu.memory_space<vmem>>, vector<128x128xf32>
    %cst_104 = arith.constant dense<0.000000e+00> : vector<8x128xf32>
    %488 = tpu.matmul %486, %487, %cst_104 {dimension_numbers = #tpu.dot_dimension_numbers<[1], [0], [0], [1], [0, 0, 1, 1], [], []>} : vector<8x128xf32>, vector<128x128xf32>, vector<8x128xf32> -> vector<8x128xf32>
    %c0_105 = arith.constant 0 : index
    %c0_106 = arith.constant 0 : index
    %489 = vector.load %arg7[%c0_105, %c0_106] : memref<1x128xf32, #tpu.memory_space<vmem>>, vector<1x128xf32>
    %490 = vector.broadcast %489 : vector<1x128xf32> to vector<8x128xf32>
    %491 = arith.addf %488, %490 : vector<8x128xf32>
    %cst_107 = arith.constant dense<0xFF800000> : vector<8xf32>
    %492 = vector.multi_reduction <maximumf>, %491, %cst_107 [1] : vector<8x128xf32> to vector<8xf32>
    %493 = vector.shape_cast %492 : vector<8xf32> to vector<8x1xf32>
    %494 = vector.broadcast %493 : vector<8x1xf32> to vector<8x128xf32>
    %495 = arith.subf %491, %494 : vector<8x128xf32>
    %496 = math.exp %495 : vector<8x128xf32>
    %cst_108 = arith.constant dense<0.000000e+00> : vector<8xf32>
    %497 = vector.multi_reduction <add>, %496, %cst_108 [1] : vector<8x128xf32> to vector<8xf32>
    %498 = vector.shape_cast %497 : vector<8xf32> to vector<8x1xf32>
    %499 = math.log %498 : vector<8x1xf32>
    %500 = vector.broadcast %499 : vector<8x1xf32> to vector<8x128xf32>
    %501 = arith.subf %495, %500 : vector<8x128xf32>
    %c0_109 = arith.constant 0 : index
    %c0_110 = arith.constant 0 : index
    %502 = vector.load %arg8[%c0_109, %c0_110] : memref<8x128xf32, #tpu.memory_space<vmem>>, vector<8x128xf32>
    tpu.vector_store %arg8[%c0_109, %c0_110], %501 {strides = array<i32>} : memref<8x128xf32, #tpu.memory_space<vmem>>, vector<8x128xf32>,
    return
  }
}

</mosaic_0001>

<bundles_post_ra>
// kernel: composer_forward.1
= control target key start
LH: loop header
LB: loop body
LE: loop exit
PB: predicated region body
PF: predicated region fallthrough
CT: control target
= control target key end

     0   :  { %13 = vsyncpa [#allocation3], 0  ;;  %s5018_s27 = smov [#allocation2]   ;;  %s6015_s0 = inlined_call_operand.vmem [shape: f32[64,32], index: 0, kind: input, shape index: {}]   ;;  %s6016_s1 = inlined_call_operand.vmem [shape: f32[3,32,128], index: 1, kind: input, shape index: {}]   ;;  %s6017_s2 = inlined_call_operand.hbm [shape: f32[3,32,128], index: 2, kind: input, shape index: {}]   ;;  %s6018_s3 = inlined_call_operand.vmem [shape: f32[3,1,128], index: 3, kind: input, shape index: {}]   ;;  %s6019_s4 = inlined_call_operand.vmem [shape: f32[32,128], index: 4, kind: input, shape index: {}]   ;;  %s6020_s5 = inlined_call_operand.vmem [shape: f32[1,128], index: 5, kind: input, shape index: {}]   ;;  %s6021_s6 = inlined_call_operand.vmem [shape: f32[128,128], index: 6, kind: input, shape index: {}]   ;;  %s6022_s7 = inlined_call_operand.vmem [shape: f32[1,128], index: 7, kind: input, shape index: {}]   ;;  %s6023_s8 = inlined_call_operand.vmem [shape: f32[8,128], index: 8, kind: output, shape index: {}]  }
   0x1   :  { %s23_s28 = sshll.u32 %s5018_s27, 4  ;;  %s24_s28 = int_to_ptr.vmem [resolvable:$true] %s23_s28 }
   0x2   :  { %s5004_s29 = scalar_lea.vmem %s24_s28, 1536  ;;  %p5009_p1 = scmp.lt.s32.totalorder %s24_s28, %s24_s28 }
   0x3   :  { %p5005_p0 = scmp.ne.s32.totalorder %s24_s28, %s5004_s29  ;;  %p5010_p2 = scmp.lt.s32.totalorder %s5004_s29, %s5004_s29 }
   0x5   :  { %p5011_p3 = por %p5010_p2, %p5009_p1 }
   0x7   :  { %p5012_p4 = pnand %p5011_p3, %p5005_p0 }
   0x9   :  { %5015 = shalt.err (!%p5012_p4)
}
   0xa   :  { %s5019_s30 = smov 128   ;;  %s5020_s9 = smov 8  }
   0xb   :  { %29 = dma.hbm_to_vmem [thread:$0]  %s6017_s2, 1536, %s24_s28, [#allocation3], %s5019_s30, %s5019_s30, %s5020_s9  }
   0xc   :  { %5016 = dma.done.wait [#allocation3], 1536  }
   0xd   :  { %5017 = vsyncadd [#allocation3], 4294965760  ;;  %v5021_v0 = vmov 0.0   ;;  %vm5022_vm0 = vmmov 0   ;;  %vm102_vm1 = vcmask 261120   ;;  %v46_v1 = vld [vmem:[%s6016_s1 + $0x18] sm:$0xff] }
   0xe   :  { %4296 = vmatprep.subr.mxu1 %v5021_v0  ;;  %4304 = vmatprep.mubr.msk.f32.mxu1 %vm5022_vm0, %v5021_v0  ;;  %v45_v2 = vld [vmem:[%s6016_s1 + $0x10] sm:$0xff]  ;;  %v87_v3 = vld [vmem:[%s6015_s0] sm:$0xff]  ;;  %v44_v4 = vld [vmem:[%s6016_s1 + $0x8] sm:$0xff]  ;;  %s5024_s15 = smov 32  }
   0xf   :  { %4265 = vmatprep.subr.mxu0 %v46_v1  ;;  %4273 = vmatprep.mubr.msk.f32.mxu0 %vm102_vm1, %v87_v3  ;;  %v5089_v5 = vld [vmem:[#allocation2 + $0x18] sm:$0xff]  ;;  %v43_v6 = vld [vmem:[%s6016_s1] sm:$0xff]  ;;  %v5095_v7 = vld [vmem:[#allocation2 + $0x10] sm:$0xff] }
  0x10   :  { %4266 = vmatpush3.msra.mxu0 %v46_v1  ;;  %4297 = vmatpush3.msra.mxu1 %v5089_v5  ;;  %v88_v8 = vld [vmem:[%s6015_s0 + $0x8] sm:$0xff]  ;;  %v89_v10 = vld [vmem:[%s6015_s0 + $0x10] sm:$0xff]  ;;  %v90_v11 = vld [vmem:[%s6015_s0 + $0x18] sm:$0xff] }
  0x11   :  { %4267 = vmatprep.subr.mxu0 %v45_v2  ;;  %4298 = vmatprep.subr.mxu1 %v5021_v0  ;;  %v5102_v9 = vld [vmem:[#allocation2 + $0x8] sm:$0xff]  ;;  %v5117_v12 = vld [vmem:[#allocation2] sm:$0xff]  ;;  %v93_v15 = vld [vmem:[%s6015_s0 + $0x30] sm:$0xff] }
  0x12   :  { %4268 = vmatpush3.msra.mxu0 %v45_v2  ;;  %4299 = vmatpush3.msra.mxu1 %v5095_v7  ;;  %v91_v13 = vld [vmem:[%s6015_s0 + $0x20] sm:$0xff]  ;;  %v92_v14 = vld [vmem:[%s6015_s0 + $0x28] sm:$0xff]  ;;  %v94_v16 = vld [vmem:[%s6015_s0 + $0x38] sm:$0xff]  ;;  %s5023_s0 = smov 64  }
  0x13   :  { %4269 = vmatprep.subr.mxu0 %v44_v4  ;;  %4300 = vmatprep.subr.mxu1 %v5021_v0  ;;  %v3958_v17 = vld [vmem:[%s6018_s3] ss:$0 sm:$0xff]  ;;  %v5172_v47 = vld [vmem:[#allocation2 + $0x38] sm:$0xff]  ;;  %v5177_v49 = vld [vmem:[#allocation2 + $0x30] sm:$0xff] }
  0x14   :  { %4270 = vmatpush3.msra.mxu0 %v44_v4  ;;  %4301 = vmatpush3.msra.mxu1 %v5102_v9  ;;  %v5181_v50 = vld [vmem:[#allocation2 + $0x28] sm:$0xff]  ;;  %v5185_v51 = vld [vmem:[#allocation2 + $0x20] sm:$0xff]  ;;  %v5204_v54 = vld [vmem:[%s6016_s1 + $0x38] sm:$0xff] }
  0x15   :  { %4271 = vmatprep.subr.mxu0 %v43_v6  ;;  %4302 = vmatprep.subr.mxu1 %v5021_v0  ;;  %v5210_v56 = vld [vmem:[%s6016_s1 + $0x30] sm:$0xff]  ;;  %v5219_v57 = vld [vmem:[%s6016_s1 + $0x28] sm:$0xff]  ;;  %v5226_v58 = vld [vmem:[%s6016_s1 + $0x20] sm:$0xff] }
  0x16   :  { %4272 = vmatpush3.msra.mxu0 %v43_v6  ;;  %4303 = vmatpush3.msra.mxu1 %v5117_v12  ;;  %v5247_v1 = vld [vmem:[%s6018_s3 + $0x1] ss:$0 sm:$0xff] }
  0x17   :  { %4274 = vmatmul.mubr.msk.f32.vlgmr.msra.gmra.mxu0 %vm102_vm1, %v88_v8  ;;  %4285 = vmatprep.subr.mxu0 %v5021_v0 }
  0x18   :  { %4286 = vmatpush3.msra.mxu0 %v5089_v5  ;;  %4276 = vmatprep.mubr.msk.f32.mxu0 %vm102_vm1, %v89_v10 }
  0x19   :  { %4287 = vmatprep.subr.mxu0 %v5021_v0  ;;  %4318 = vmatprep.subr.mxu1 %v5021_v0 }
  0x1a   :  { %4288 = vmatpush3.msra.mxu0 %v5095_v7 }
  0x1b   :  { %4277 = vmatmul.mubr.msk.f32.gmra.mxu0 %vm102_vm1, %v90_v11  ;;  %4289 = vmatprep.subr.mxu0 %v5021_v0 }
  0x1c   :  { %4279 = vmatprep.mubr.msk.f32.mxu0 %vm102_vm1, %v91_v13  ;;  %4290 = vmatpush3.msra.mxu0 %v5102_v9 }
  0x1d   :  { %4291 = vmatprep.subr.mxu0 %v5021_v0 }
  0x1e   :  { %4292 = vmatpush3.msra.mxu0 %v5117_v12 }
  0x1f   :  { %4280 = vmatmul.mubr.msk.f32.gmra.mxu0 %vm102_vm1, %v92_v14  ;;  %4307 = vmatprep.subr.mxu0 %v5021_v0 }
  0x20   :  { %4282 = vmatprep.mubr.msk.f32.mxu0 %vm102_vm1, %v93_v15 }
  0x23   :  { %4283 = vmatmul.mubr.msk.f32.gmra.mxu0 %vm102_vm1, %v94_v16 }
  0x24   :  { %4293 = vmatprep.mubr.msk.f32.mxu0 %vm5022_vm0, %v5021_v0 }
  0x27   :  { %4294 = vmatmul.mubr.f32.vlgmr.msra.gmra.mxu0 %v5021_v0 }
  0x28   :  { %4315 = vmatprep.mubr.msk.f32.mxu0 %vm5022_vm0, %v5021_v0  ;;  %4308 = vmatpush3.msra.mxu0 %v5172_v47 }
  0x29   :  { %4309 = vmatprep.subr.mxu0 %v5021_v0 }
  0x2a   :  { %4310 = vmatpush3.msra.mxu0 %v5177_v49 }
  0x2b   :  { %4311 = vmatprep.subr.mxu0 %v5021_v0 }
  0x2c   :  { %4312 = vmatpush3.msra.mxu0 %v5181_v50 }
  0x2d   :  { %4313 = vmatprep.subr.mxu0 %v5021_v0 }
  0x2e   :  { %4314 = vmatpush3.msra.mxu0 %v5185_v51 }
  0x2f   :  { %4316 = vmatmul.mubr.f32.vlgmr.msra.gmra.mxu0 %v5021_v0  ;;  %4329 = vmatprep.subr.mxu0 %v5021_v0 }
  0x30   :  { %4330 = vmatpush3.msra.mxu0 %v5089_v5  ;;  %4337 = vmatprep.mubr.msk.f32.mxu0 %vm5022_vm0, %v5021_v0 }
  0x31   :  { %4331 = vmatprep.subr.mxu0 %v5021_v0 }
  0x32   :  { %4332 = vmatpush3.msra.mxu0 %v5095_v7 }
  0x33   :  { %4333 = vmatprep.subr.mxu0 %v5021_v0 }
  0x34   :  { %4334 = vmatpush3.msra.mxu0 %v5102_v9 }
  0x35   :  { %4335 = vmatprep.subr.mxu0 %v5021_v0 }
  0x36   :  { %4336 = vmatpush3.msra.mxu0 %v5117_v12 }
  0x37   :  { %4351 = vmatprep.subr.mxu0 %v5021_v0 }
  0xd7   :  { %v4275_v18 = vpop.f32.mrf.mxu0 }
  0xd8   :  { %v5153_v19 = vadd.f32 %v4275_v18, %v3958_v17 }
  0xd9   :  { %v193_v20 = vpop.f32.mrf.mxu0 }
  0xda   :  { %v194_v32 = vadd.f32 %v3958_v17, %v193_v20 }
  0xdb   :  { %v4278_v21 = vpop.f32.mrf.mxu0 }
  0xdc   :  { %v5155_v22 = vadd.f32 %v4278_v21, %v3958_v17 }
  0xdd   :  { %v203_v23 = vpop.f32.mrf.mxu0 }
  0xde   :  { %v5157_v24 = vadd.f32 %v3958_v17, %v203_v23 }
  0xdf   :  { %v4281_v25 = vpop.f32.mrf.mxu0 }
  0xe0   :  { %v5159_v26 = vadd.f32 %v4281_v25, %v3958_v17 }
  0xe1   :  { %v213_v27 = vpop.f32.mrf.mxu0 }
  0xe2   :  { %v5161_v28 = vadd.f32 %v3958_v17, %v213_v27 }
  0xe3   :  { %v4284_v29 = vpop.f32.mrf.mxu0 }
  0xe4   :  { %v5163_v30 = vadd.f32 %v4284_v29, %v3958_v17 }
  0xe5   :  { %v223_v31 = vpop.f32.mrf.mxu0 }
  0xe6   :  { %v5165_v33 = vadd.f32 %v3958_v17, %v223_v31 }
  0xe7   :  { %v301_v34 = vpop.f32.mrf.mxu0 }
  0xe8   :  { %v305_v35 = vadd.f32 %v301_v34, %v194_v32 }
  0xe9   :  { %v4295_v36 = vpop.f32.mrf.mxu0 }
  0xea   :  { %4778 = vtanh.f32 %v305_v35  ;;  %v3967_v38 = vmul.f32 -1.442695, %v305_v35 }
  0xec   :  { %4780 = vpow2.f32 %v3967_v38 }
  0xef   :  { %v496_v59 = vpop.f32.mrf.mxu0 }
  0xf1   :  { %v4317_v60 = vpop.f32.mrf.mxu0 }
  0xf7   :  { %v4779_v37 = vpop.eup %4778 }
  0xf8   :  { %315 = vrot.lane.b32.xlu0 %v4779_v37, %s5023_s0 }
  0xf9   :  { %v4781_v39 = vpop.eup %4780 }
  0xfa   :  { %v309_v40 = vadd.f32 1.0, %v4781_v39 }
  0xfc   :  { %4782 = vrcp.f32 %v309_v40 }
 0x109   :  { %v4783_v41 = vpop.eup %4782 }
 0x10a   :  { %v313_v44 = vmul.f32 0.0, %v4783_v41 }
 0x16a   :  { %v316_v42 = vpop.permute.xlu0 %315 }
 0x16b   :  { %v318_v43 = vmul.f32 %v4783_v41, %v316_v42 }
 0x16d   :  { %320 = vrot.lane.b32.xlu0 %v318_v43, %s5024_s15  ;;  %v5277_v43 = vld [vmem:[%s6016_s1 + $0x58] sm:$0xff] }
 0x1df   :  { %v321_v45 = vpop.permute.xlu0 %320 }
 0x1e0   :  { %v5169_v46 = vadd.f32 %v321_v45, %v313_v44  ;;  %v5282_v44 = vld [vmem:[#allocation2 + $0x58] sm:$0xff]  ;;  %v5287_v45 = vld [vmem:[%s6016_s1 + $0x50] sm:$0xff] }
 0x1e2   :  { %4784 = vtanh.f32 %v5169_v46 }
 0x1ef   :  { %v4785_v48 = vpop.eup %4784 }
 0x1f0   :  { %326 = vrot.lane.b32.xlu1 %v4785_v48, %s5023_s0  ;;  %v5294_v48 = vld [vmem:[#allocation2 + $0x50] sm:$0xff] }
 0x262   :  { %v327_v52 = vpop.permute.xlu1 %326 }
 0x263   :  { %v329_v53 = vmul.f32 %v4783_v41, %v327_v52  ;;  %v5299_v52 = vld [vmem:[%s6016_s1 + $0x48] sm:$0xff] }
 0x265   :  { %331 = vrot.lane.b32.xlu1 %v329_v53, %s5024_s15  ;;  %v5305_v53 = vld [vmem:[#allocation2 + $0x48] sm:$0xff] }
 0x2d7   :  { %v332_v55 = vpop.permute.xlu1 %331 }
 0x2d8   :  { %4305 = vmatmul.mubr.msk.f32.vlgmr.msra.gmra.mxu1 %vm102_vm1, %v332_v55 }
 0x2d9   :  { %4319 = vmatpush3.msra.mxu1 %v5204_v54  ;;  %4326 = vmatprep.mubr.msk.f32.mxu1 %vm5022_vm0, %v5021_v0 }
 0x2da   :  { %4320 = vmatprep.subr.mxu1 %v5021_v0 }
 0x2db   :  { %4321 = vmatpush3.msra.mxu1 %v5210_v56 }
 0x2dc   :  { %4322 = vmatprep.subr.mxu1 %v5021_v0 }
 0x2dd   :  { %4323 = vmatpush3.msra.mxu1 %v5219_v57 }
 0x2de   :  { %4324 = vmatprep.subr.mxu1 %v5021_v0 }
 0x2df   :  { %4325 = vmatpush3.msra.mxu1 %v5226_v58 }
 0x2e0   :  { %4327 = vmatmul.mubr.msk.f32.vlgmr.msra.gmra.mxu1 %vm102_vm1, %v332_v55  ;;  %4340 = vmatprep.subr.mxu1 %v5021_v0  ;;  %v5310_v55 = vld [vmem:[%s6016_s1 + $0x40] sm:$0xff] }
 0x2e1   :  { %4341 = vmatpush3.msra.mxu1 %v5172_v47  ;;  %4348 = vmatprep.mubr.msk.f32.mxu1 %vm5022_vm0, %v5021_v0 }
 0x2e2   :  { %4342 = vmatprep.subr.mxu1 %v5021_v0 }
 0x2e3   :  { %4343 = vmatpush3.msra.mxu1 %v5177_v49 }
 0x2e4   :  { %4344 = vmatprep.subr.mxu1 %v5021_v0 }
 0x2e5   :  { %4345 = vmatpush3.msra.mxu1 %v5181_v50 }
 0x2e6   :  { %4346 = vmatprep.subr.mxu1 %v5021_v0 }
 0x2e7   :  { %4347 = vmatpush3.msra.mxu1 %v5185_v51 }
 0x2e8   :  { %4362 = vmatprep.subr.mxu1 %v5021_v0 }
 0x398   :  { %v401_v61 = vpop.f32.mrf.mxu1 }
 0x399   :  { %v405_v62 = vadd.f32 %v401_v61, %v5153_v19 }
 0x39a   :  { %v4306_v63 = vpop.f32.mrf.mxu1 }
 0x39b   :  { %4786 = vtanh.f32 %v405_v62  ;;  %v3969_v11 = vmul.f32 -1.442695, %v405_v62 }
 0x3a0   :  { %v566_v2 = vpop.f32.mrf.mxu1 }
 0x3a1   :  { %v567_v3 = vadd.f32 %v566_v2, %v496_v59  ;;  %v5316_v59 = vld [vmem:[#allocation2 + $0x40] sm:$0xff] }
 0x3a2   :  { %v4328_v4 = vpop.f32.mrf.mxu1 }
 0x3a3   :  { %v570_v6 = vadd.f32 %v5247_v1, %v567_v3 }
 0x3a5   :  { %4788 = vtanh.f32 %v570_v6  ;;  %v3971_v13 = vmul.f32 -1.442695, %v570_v6 }
 0x3a6   :  { %4790 = vpow2.f32 %v3969_v11 }
 0x3a7   :  { %4792 = vpow2.f32 %v3971_v13  ;;  %v5354_v13 = vld [vmem:[%s6018_s3 + $0x2] ss:$0 sm:$0xff] }
 0x3a8   :  { %v4787_v8 = vpop.eup %4786 }
 0x3a9   :  { %415 = vrot.lane.b32.xlu0 %v4787_v8, %s5023_s0 }
 0x3b2   :  { %v4789_v10 = vpop.eup %4788 }
 0x3b3   :  { %580 = vrot.lane.b32.xlu1 %v4789_v10, %s5023_s0  ;;  %v4791_v14 = vpop.eup %4790 }
 0x3b4   :  { %v409_v15 = vadd.f32 1.0, %v4791_v14  ;;  %v4793_v16 = vpop.eup %4792 }
 0x3b5   :  { %v574_v17 = vadd.f32 1.0, %v4793_v16 }
 0x3b6   :  { %4794 = vrcp.f32 %v409_v15 }
 0x3b7   :  { %4796 = vrcp.f32 %v574_v17 }
 0x3c3   :  { %v4795_v18 = vpop.eup %4794 }
 0x3c4   :  { %v4797_v21 = vpop.eup %4796  ;;  %v413_v27 = vmul.f32 %v4795_v18, %v5169_v46 }
 0x3c5   :  { %v578_v32 = vmul.f32 0.0, %v4797_v21 }
 0x41b   :  { %v416_v19 = vpop.permute.xlu0 %415 }
 0x41c   :  { %v418_v20 = vmul.f32 %v4795_v18, %v416_v19 }
 0x41e   :  { %420 = vrot.lane.b32.xlu0 %v418_v20, %s5024_s15 }
 0x425   :  { %v581_v23 = vpop.permute.xlu1 %580 }
 0x426   :  { %v583_v25 = vmul.f32 %v4797_v21, %v581_v23 }
 0x428   :  { %585 = vrot.lane.b32.xlu1 %v583_v25, %s5024_s15 }
 0x490   :  { %v421_v29 = vpop.permute.xlu0 %420 }
 0x491   :  { %v5255_v31 = vadd.f32 %v421_v29, %v413_v27 }
 0x493   :  { %4798 = vtanh.f32 %v5255_v31 }
 0x49a   :  { %v586_v34 = vpop.permute.xlu1 %585 }
 0x49b   :  { %v5258_v35 = vadd.f32 %v586_v34, %v578_v32 }
 0x49d   :  { %4800 = vtanh.f32 %v5258_v35 }
 0x4a0   :  { %v4799_v36 = vpop.eup %4798 }
 0x4a1   :  { %426 = vrot.lane.b32.xlu0 %v4799_v36, %s5023_s0 }
 0x4aa   :  { %v4801_v37 = vpop.eup %4800 }
 0x4ab   :  { %591 = vrot.lane.b32.xlu1 %v4801_v37, %s5023_s0 }
 0x513   :  { %v427_v38 = vpop.permute.xlu0 %426 }
 0x514   :  { %v429_v39 = vmul.f32 %v4795_v18, %v427_v38 }
 0x516   :  { %596 = vrot.lane.b32.xlu0 %v429_v39, %s5024_s15 }
 0x51d   :  { %v592_v40 = vpop.permute.xlu1 %591 }
 0x51e   :  { %v594_v41 = vmul.f32 %v4797_v21, %v592_v40 }
 0x520   :  { %696 = vrot.lane.b32.xlu1 %v594_v41, %s5024_s15 }
 0x588   :  { %v597_v42 = vpop.permute.xlu0 %596 }
 0x589   :  { %4338 = vmatmul.mubr.msk.f32.vlgmr.msra.gmra.mxu0 %vm102_vm1, %v597_v42 }
 0x58a   :  { %4352 = vmatpush3.msra.mxu0 %v5204_v54  ;;  %4359 = vmatprep.mubr.msk.f32.mxu0 %vm5022_vm0, %v5021_v0 }
 0x58b   :  { %4353 = vmatprep.subr.mxu0 %v5021_v0 }
 0x58c   :  { %4354 = vmatpush3.msra.mxu0 %v5210_v56 }
 0x58d   :  { %4355 = vmatprep.subr.mxu0 %v5021_v0 }
 0x58e   :  { %4356 = vmatpush3.msra.mxu0 %v5219_v57 }
 0x58f   :  { %4357 = vmatprep.subr.mxu0 %v5021_v0 }
 0x590   :  { %4358 = vmatpush3.msra.mxu0 %v5226_v58 }
 0x591   :  { %4360 = vmatmul.mubr.msk.f32.vlgmr.msra.gmra.mxu0 %vm102_vm1, %v597_v42  ;;  %4373 = vmatprep.subr.mxu0 %v5021_v0 }
 0x592   :  { %4374 = vmatpush3.msra.mxu0 %v5277_v43  ;;  %v697_v46 = vpop.permute.xlu1 %696  ;;  %4381 = vmatprep.mubr.msk.f32.mxu0 %vm5022_vm0, %v5021_v0 }
 0x593   :  { %4349 = vmatmul.mubr.msk.f32.vlgmr.msra.gmra.mxu1 %vm102_vm1, %v697_v46  ;;  %4375 = vmatprep.subr.mxu0 %v5021_v0 }
 0x594   :  { %4363 = vmatpush3.msra.mxu1 %v5282_v44  ;;  %4376 = vmatpush3.msra.mxu0 %v5287_v45 }
 0x595   :  { %4364 = vmatprep.subr.mxu1 %v5021_v0  ;;  %4377 = vmatprep.subr.mxu0 %v5021_v0 }
 0x596   :  { %4365 = vmatpush3.msra.mxu1 %v5294_v48  ;;  %4378 = vmatpush3.msra.mxu0 %v5299_v52 }
 0x597   :  { %4366 = vmatprep.subr.mxu1 %v5021_v0  ;;  %4379 = vmatprep.subr.mxu0 %v5021_v0 }
 0x598   :  { %4367 = vmatpush3.msra.mxu1 %v5305_v53  ;;  %4380 = vmatpush3.msra.mxu0 %v5310_v55 }
 0x599   :  { %4368 = vmatprep.subr.mxu1 %v5021_v0  ;;  %4370 = vmatprep.mubr.msk.f32.mxu1 %vm5022_vm0, %v5021_v0 }
 0x59a   :  { %4369 = vmatpush3.msra.mxu1 %v5316_v59  ;;  %4382 = vmatmul.mubr.msk.f32.vlgmr.msra.gmra.mxu0 %vm102_vm1, %v697_v46 }
 0x59b   :  { %4371 = vmatmul.mubr.f32.vlgmr.msra.gmra.mxu1 %v5021_v0  ;;  %4384 = vmatprep.subr.mxu1 %v5021_v0 }
 0x59c   :  { %4385 = vmatpush3.msra.mxu1 %v5089_v5  ;;  %4392 = vmatprep.mubr.msk.f32.mxu1 %vm5022_vm0, %v5021_v0 }
 0x59d   :  { %4386 = vmatprep.subr.mxu1 %v5021_v0  ;;  %4395 = vmatprep.subr.mxu0 %v5021_v0 }
 0x59e   :  { %4387 = vmatpush3.msra.mxu1 %v5095_v7  ;;  %4396 = vmatpush3.msra.mxu0 %v5172_v47 }
 0x59f   :  { %4388 = vmatprep.subr.mxu1 %v5021_v0  ;;  %4397 = vmatprep.subr.mxu0 %v5021_v0 }
 0x5a0   :  { %4389 = vmatpush3.msra.mxu1 %v5102_v9  ;;  %4398 = vmatpush3.msra.mxu0 %v5177_v49 }
 0x5a1   :  { %4390 = vmatprep.subr.mxu1 %v5021_v0  ;;  %4399 = vmatprep.subr.mxu0 %v5021_v0 }
 0x5a2   :  { %4391 = vmatpush3.msra.mxu1 %v5117_v12  ;;  %4400 = vmatpush3.msra.mxu0 %v5181_v50 }
 0x5a3   :  { %4406 = vmatprep.subr.mxu1 %v5021_v0  ;;  %4401 = vmatprep.subr.mxu0 %v5021_v0 }
 0x5a4   :  { %4402 = vmatpush3.msra.mxu0 %v5185_v51  ;;  %4403 = vmatprep.mubr.msk.f32.mxu0 %vm5022_vm0, %v5021_v0 }
 0x5a5   :  { %4417 = vmatprep.subr.mxu0 %v5021_v0 }
 0x649   :  { %v666_v60 = vpop.f32.mrf.mxu0 }
 0x64a   :  { %v670_v61 = vadd.f32 %v666_v60, %v5157_v24 }
 0x64b   :  { %v4339_v62 = vpop.f32.mrf.mxu0 }
 0x64c   :  { %4802 = vtanh.f32 %v670_v61  ;;  %v3973_v20 = vmul.f32 -1.442695, %v670_v61 }
 0x651   :  { %v836_v63 = vpop.f32.mrf.mxu0 }
 0x653   :  { %v766_v2 = vpop.f32.mrf.mxu1  ;;  %v4361_v3 = vpop.f32.mrf.mxu0 }
 0x654   :  { %v837_v4 = vadd.f32 %v836_v63, %v766_v2 }
 0x655   :  { %v4350_v6 = vpop.f32.mrf.mxu1 }
 0x656   :  { %v840_v8 = vadd.f32 %v5247_v1, %v837_v4 }
 0x658   :  { %4804 = vtanh.f32 %v840_v8  ;;  %v3976_v21 = vmul.f32 -1.442695, %v840_v8 }
 0x659   :  { %v4803_v10 = vpop.eup %4802 }
 0x65a   :  { %v1001_v11 = vpop.f32.mrf.mxu0  ;;  %680 = vrot.lane.b32.xlu0 %v4803_v10, %s5023_s0 }
 0x65b   :  { %v931_v24 = vpop.f32.mrf.mxu1 }
 0x65c   :  { %v1002_v14 = vadd.f32 %v1001_v11, %v931_v24  ;;  %v4383_v15 = vpop.f32.mrf.mxu0 }
 0x65d   :  { %v4372_v16 = vpop.f32.mrf.mxu1 }
 0x65e   :  { %v1005_v17 = vadd.f32 %v5354_v13, %v1002_v14 }
 0x660   :  { %4806 = vtanh.f32 %v1005_v17  ;;  %v3978_v27 = vmul.f32 -1.442695, %v1005_v17 }
 0x661   :  { %4808 = vpow2.f32 %v3973_v20 }
 0x662   :  { %4810 = vpow2.f32 %v3976_v21 }
 0x665   :  { %v4805_v18 = vpop.eup %4804 }
 0x666   :  { %850 = vrot.lane.b32.xlu1 %v4805_v18, %s5023_s0 }
 0x66d   :  { %v4807_v19 = vpop.eup %4806 }
 0x66e   :  { %1015 = vrot.lane.b32.xlu0 %v4807_v19, %s5023_s0  ;;  %v4809_v23 = vpop.eup %4808 }
 0x66f   :  { %v674_v25 = vadd.f32 1.0, %v4809_v23  ;;  %v4811_v29 = vpop.eup %4810 }
 0x670   :  { %v844_v32 = vadd.f32 1.0, %v4811_v29 }
 0x671   :  { %4812 = vrcp.f32 %v674_v25 }
 0x672   :  { %4814 = vpow2.f32 %v3978_v27 }
 0x673   :  { %4816 = vrcp.f32 %v844_v32 }
 0x67e   :  { %v4813_v34 = vpop.eup %4812 }
 0x67f   :  { %v4815_v36 = vpop.eup %4814  ;;  %v678_v62 = vmul.f32 %v4813_v34, %v5255_v31 }
 0x680   :  { %v1009_v39 = vadd.f32 1.0, %v4815_v36  ;;  %v4817_v40 = vpop.eup %4816 }
 0x681   :  { %v848_v3 = vmul.f32 %v4817_v40, %v5258_v35 }
 0x682   :  { %4818 = vrcp.f32 %v1009_v39 }
 0x68f   :  { %v4819_v46 = vpop.eup %4818 }
 0x690   :  { %v1013_v10 = vmul.f32 0.0, %v4819_v46 }
 0x6cc   :  { %v681_v37 = vpop.permute.xlu0 %680 }
 0x6cd   :  { %v683_v38 = vmul.f32 %v4813_v34, %v681_v37 }
 0x6cf   :  { %685 = vrot.lane.b32.xlu1 %v683_v38, %s5024_s15 }
 0x6d8   :  { %v851_v41 = vpop.permute.xlu1 %850 }
 0x6d9   :  { %v853_v42 = vmul.f32 %v4817_v40, %v851_v41 }
 0x6db   :  { %855 = vrot.lane.b32.xlu0 %v853_v42, %s5024_s15 }
 0x6e0   :  { %v1016_v60 = vpop.permute.xlu0 %1015 }
 0x6e1   :  { %v1018_v61 = vmul.f32 %v4819_v46, %v1016_v60 }
 0x6e3   :  { %1020 = vrot.lane.b32.xlu1 %v1018_v61, %s5024_s15 }
 0x741   :  { %v686_v63 = vpop.permute.xlu1 %685 }
 0x742   :  { %v5363_v2 = vadd.f32 %v686_v63, %v678_v62 }
 0x744   :  { %4820 = vtanh.f32 %v5363_v2 }
 0x74d   :  { %v856_v4 = vpop.permute.xlu0 %855 }
 0x74e   :  { %v5367_v6 = vadd.f32 %v856_v4, %v848_v3 }
 0x750   :  { %4822 = vtanh.f32 %v5367_v6 }
 0x751   :  { %v4821_v8 = vpop.eup %4820 }
 0x752   :  { %691 = vrot.lane.b32.xlu0 %v4821_v8, %s5023_s0 }
 0x755   :  { %v1021_v11 = vpop.permute.xlu1 %1020 }
 0x756   :  { %v5371_v24 = vadd.f32 %v1021_v11, %v1013_v10 }
 0x758   :  { %4824 = vtanh.f32 %v5371_v24 }
 0x75d   :  { %v4823_v31 = vpop.eup %4822 }
 0x75e   :  { %861 = vrot.lane.b32.xlu1 %v4823_v31, %s5023_s0 }
 0x765   :  { %v4825_v14 = vpop.eup %4824 }
 0x766   :  { %1026 = vrot.lane.b32.xlu0 %v4825_v14, %s5023_s0 }
 0x7c4   :  { %v692_v35 = vpop.permute.xlu0 %691 }
 0x7c5   :  { %v694_v15 = vmul.f32 %v4813_v34, %v692_v35 }
 0x7c7   :  { %1031 = vrot.lane.b32.xlu1 %v694_v15, %s5024_s15 }
 0x7d0   :  { %v862_v16 = vpop.permute.xlu1 %861 }
 0x7d1   :  { %v864_v17 = vmul.f32 %v4817_v40, %v862_v16 }
 0x7d3   :  { %1131 = vrot.lane.b32.xlu0 %v864_v17, %s5024_s15 }
 0x7d8   :  { %v1027_v18 = vpop.permute.xlu0 %1026 }
 0x7d9   :  { %v1029_v19 = vmul.f32 %v4819_v46, %v1027_v18 }
 0x7db   :  { %1301 = vrot.lane.b32.xlu1 %v1029_v19, %s5024_s15 }
 0x839   :  { %v1032_v20 = vpop.permute.xlu1 %1031 }
 0x83a   :  { %4393 = vmatmul.mubr.msk.f32.vlgmr.msra.gmra.mxu1 %vm102_vm1, %v1032_v20 }
 0x83b   :  { %4407 = vmatpush3.msra.mxu1 %v5204_v54  ;;  %4414 = vmatprep.mubr.msk.f32.mxu1 %vm5022_vm0, %v5021_v0 }
 0x83c   :  { %4408 = vmatprep.subr.mxu1 %v5021_v0 }
 0x83d   :  { %4409 = vmatpush3.msra.mxu1 %v5210_v56 }
 0x83e   :  { %4410 = vmatprep.subr.mxu1 %v5021_v0 }
 0x83f   :  { %4411 = vmatpush3.msra.mxu1 %v5219_v57 }
 0x840   :  { %4412 = vmatprep.subr.mxu1 %v5021_v0 }
 0x841   :  { %4413 = vmatpush3.msra.mxu1 %v5226_v58 }
 0x842   :  { %4415 = vmatmul.mubr.msk.f32.vlgmr.msra.gmra.mxu1 %vm102_vm1, %v1032_v20  ;;  %4428 = vmatprep.subr.mxu1 %v5021_v0 }
 0x843   :  { %4429 = vmatpush3.msra.mxu1 %v5277_v43  ;;  %4436 = vmatprep.mubr.msk.f32.mxu1 %vm5022_vm0, %v5021_v0 }
 0x844   :  { %4430 = vmatprep.subr.mxu1 %v5021_v0 }
 0x845   :  { %4431 = vmatpush3.msra.mxu1 %v5287_v45  ;;  %v1132_v21 = vpop.permute.xlu0 %1131 }
 0x846   :  { %4404 = vmatmul.mubr.msk.f32.vlgmr.msra.gmra.mxu0 %vm102_vm1, %v1132_v21  ;;  %4432 = vmatprep.subr.mxu1 %v5021_v0 }
 0x847   :  { %4418 = vmatpush3.msra.mxu0 %v5282_v44  ;;  %4433 = vmatpush3.msra.mxu1 %v5299_v52 }
 0x848   :  { %4419 = vmatprep.subr.mxu0 %v5021_v0  ;;  %4434 = vmatprep.subr.mxu1 %v5021_v0 }
 0x849   :  { %4420 = vmatpush3.msra.mxu0 %v5294_v48  ;;  %4435 = vmatpush3.msra.mxu1 %v5310_v55 }
 0x84a   :  { %4421 = vmatprep.subr.mxu0 %v5021_v0  ;;  %4437 = vmatmul.mubr.msk.f32.vlgmr.msra.gmra.mxu1 %vm102_vm1, %v1132_v21 }
 0x84b   :  { %4422 = vmatpush3.msra.mxu0 %v5305_v53  ;;  %4425 = vmatprep.mubr.msk.f32.mxu0 %vm5022_vm0, %v5021_v0 }
 0x84c   :  { %4423 = vmatprep.subr.mxu0 %v5021_v0  ;;  %4450 = vmatprep.subr.mxu1 %v5021_v0 }
 0x84d   :  { %v1302_v23 = vpop.permute.xlu1 %1301  ;;  %4424 = vmatpush3.msra.mxu0 %v5316_v59  ;;  %4451 = vmatpush3.msra.mxu1 %v5172_v47 }
 0x84e   :  { %4426 = vmatmul.mubr.msk.f32.vlgmr.msra.gmra.mxu0 %vm102_vm1, %v1302_v23  ;;  %4439 = vmatprep.subr.mxu0 %v5021_v0 }
 0x84f   :  { %4440 = vmatpush3.msra.mxu0 %v5089_v5  ;;  %4447 = vmatprep.mubr.msk.f32.mxu0 %vm5022_vm0, %v5021_v0 }
 0x850   :  { %4441 = vmatprep.subr.mxu0 %v5021_v0  ;;  %4452 = vmatprep.subr.mxu1 %v5021_v0 }
 0x851   :  { %4442 = vmatpush3.msra.mxu0 %v5095_v7  ;;  %4453 = vmatpush3.msra.mxu1 %v5177_v49 }
 0x852   :  { %4443 = vmatprep.subr.mxu0 %v5021_v0  ;;  %4454 = vmatprep.subr.mxu1 %v5021_v0 }
 0x853   :  { %4444 = vmatpush3.msra.mxu0 %v5102_v9  ;;  %4455 = vmatpush3.msra.mxu1 %v5181_v50 }
 0x854   :  { %4445 = vmatprep.subr.mxu0 %v5021_v0  ;;  %4456 = vmatprep.subr.mxu1 %v5021_v0 }
 0x855   :  { %4446 = vmatpush3.msra.mxu0 %v5117_v12  ;;  %4457 = vmatpush3.msra.mxu1 %v5185_v51 }
 0x856   :  { %4461 = vmatprep.subr.mxu0 %v5021_v0  ;;  %4458 = vmatprep.mubr.msk.f32.mxu1 %vm5022_vm0, %v5021_v0 }
 0x857   :  { %4472 = vmatprep.subr.mxu1 %v5021_v0 }
 0x8fa   :  { %v1101_v25 = vpop.f32.mrf.mxu1 }
 0x8fb   :  { %v1105_v27 = vadd.f32 %v1101_v25, %v5155_v22 }
 0x8fc   :  { %v4394_v29 = vpop.f32.mrf.mxu1 }
 0x8fd   :  { %4826 = vtanh.f32 %v1105_v27  ;;  %v3980_v3 = vmul.f32 -1.442695, %v1105_v27 }
 0x902   :  { %v1271_v32 = vpop.f32.mrf.mxu1 }
 0x904   :  { %v4416_v34 = vpop.f32.mrf.mxu1 }
 0x906   :  { %v1201_v36 = vpop.f32.mrf.mxu0 }
 0x907   :  { %v1272_v37 = vadd.f32 %v1271_v32, %v1201_v36 }
 0x908   :  { %v4405_v38 = vpop.f32.mrf.mxu0 }
 0x909   :  { %v1275_v39 = vadd.f32 %v5247_v1, %v1272_v37 }
 0x90a   :  { %v4827_v40 = vpop.eup %4826  ;;  %v1441_v41 = vpop.f32.mrf.mxu1 }
 0x90b   :  { %4828 = vtanh.f32 %v1275_v39  ;;  %1115 = vrot.lane.b32.xlu0 %v4827_v40, %s5023_s0  ;;  %v3983_v4 = vmul.f32 -1.442695, %v1275_v39 }
 0x90c   :  { %v4438_v42 = vpop.f32.mrf.mxu1 }
 0x90e   :  { %v1371_v46 = vpop.f32.mrf.mxu0 }
 0x90f   :  { %v1442_v60 = vadd.f32 %v1441_v41, %v1371_v46 }
 0x910   :  { %v4427_v61 = vpop.f32.mrf.mxu0 }
 0x911   :  { %v1445_v22 = vadd.f32 %v5354_v13, %v1442_v60 }
 0x913   :  { %4830 = vtanh.f32 %v1445_v22  ;;  %v3986_v11 = vmul.f32 -1.442695, %v1445_v22 }
 0x914   :  { %4832 = vpow2.f32 %v3980_v3 }
 0x915   :  { %4834 = vpow2.f32 %v3983_v4 }
 0x918   :  { %v4829_v62 = vpop.eup %4828 }
 0x919   :  { %1285 = vrot.lane.b32.xlu1 %v4829_v62, %s5023_s0 }
 0x920   :  { %v4831_v63 = vpop.eup %4830 }
 0x921   :  { %1455 = vrot.lane.b32.xlu0 %v4831_v63, %s5023_s0  ;;  %v4833_v8 = vpop.eup %4832 }
 0x922   :  { %v1109_v10 = vadd.f32 1.0, %v4833_v8  ;;  %v4835_v31 = vpop.eup %4834 }
 0x923   :  { %v1279_v14 = vadd.f32 1.0, %v4835_v31 }
 0x924   :  { %4836 = vrcp.f32 %v1109_v10 }
 0x925   :  { %4838 = vpow2.f32 %v3986_v11 }
 0x926   :  { %4840 = vrcp.f32 %v1279_v14 }
 0x931   :  { %v4837_v35 = vpop.eup %4836 }
 0x932   :  { %v4839_v17 = vpop.eup %4838  ;;  %v1113_v29 = vmul.f32 %v4837_v35, %v5363_v2 }
 0x933   :  { %v1449_v18 = vadd.f32 1.0, %v4839_v17  ;;  %v4841_v19 = vpop.eup %4840 }
 0x934   :  { %v1283_v36 = vmul.f32 %v4841_v19, %v5367_v6 }
 0x935   :  { %4842 = vrcp.f32 %v1449_v18 }
 0x942   :  { %v4843_v23 = vpop.eup %4842 }
 0x943   :  { %v1453_v40 = vmul.f32 %v4843_v23, %v5371_v24 }
 0x97d   :  { %v1116_v15 = vpop.permute.xlu0 %1115 }
 0x97e   :  { %v1118_v16 = vmul.f32 %v4837_v35, %v1116_v15 }
 0x980   :  { %1120 = vrot.lane.b32.xlu1 %v1118_v16, %s5024_s15 }
 0x98b   :  { %v1286_v20 = vpop.permute.xlu1 %1285 }
 0x98c   :  { %v1288_v21 = vmul.f32 %v4841_v19, %v1286_v20 }
 0x98e   :  { %1290 = vrot.lane.b32.xlu0 %v1288_v21, %s5024_s15 }
 0x993   :  { %v1456_v25 = vpop.permute.xlu0 %1455 }
 0x994   :  { %v1458_v27 = vmul.f32 %v4843_v23, %v1456_v25 }
 0x996   :  { %1460 = vrot.lane.b32.xlu1 %v1458_v27, %s5024_s15 }
 0x9f2   :  { %v1121_v32 = vpop.permute.xlu1 %1120 }
 0x9f3   :  { %v5444_v34 = vadd.f32 %v1121_v32, %v1113_v29 }
 0x9f5   :  { %4844 = vtanh.f32 %v5444_v34 }
 0xa00   :  { %v1291_v37 = vpop.permute.xlu0 %1290 }
 0xa01   :  { %v5448_v38 = vadd.f32 %v1291_v37, %v1283_v36 }
 0xa02   :  { %v4845_v39 = vpop.eup %4844 }
 0xa03   :  { %4846 = vtanh.f32 %v5448_v38  ;;  %1126 = vrot.lane.b32.xlu0 %v4845_v39, %s5023_s0 }
 0xa08   :  { %v1461_v41 = vpop.permute.xlu1 %1460 }
 0xa09   :  { %v5453_v42 = vadd.f32 %v1461_v41, %v1453_v40 }
 0xa0b   :  { %4848 = vtanh.f32 %v5453_v42 }
 0xa10   :  { %v4847_v2 = vpop.eup %4846 }
 0xa11   :  { %1296 = vrot.lane.b32.xlu1 %v4847_v2, %s5023_s0 }
 0xa18   :  { %v4849_v46 = vpop.eup %4848 }
 0xa19   :  { %1466 = vrot.lane.b32.xlu0 %v4849_v46, %s5023_s0 }
 0xa75   :  { %v1127_v6 = vpop.permute.xlu0 %1126 }
 0xa76   :  { %v1129_v60 = vmul.f32 %v4837_v35, %v1127_v6 }
 0xa78   :  { %1471 = vrot.lane.b32.xlu1 %v1129_v60, %s5024_s15 }
 0xa83   :  { %v1297_v61 = vpop.permute.xlu1 %1296 }
 0xa84   :  { %v1299_v22 = vmul.f32 %v4841_v19, %v1297_v61 }
 0xa86   :  { %1571 = vrot.lane.b32.xlu0 %v1299_v22, %s5024_s15 }
 0xa8b   :  { %v1467_v24 = vpop.permute.xlu0 %1466 }
 0xa8c   :  { %v1469_v62 = vmul.f32 %v4843_v23, %v1467_v24 }
 0xa8e   :  { %1741 = vrot.lane.b32.xlu1 %v1469_v62, %s5024_s15 }
 0xaea   :  { %v1472_v63 = vpop.permute.xlu1 %1471 }
 0xaeb   :  { %4448 = vmatmul.mubr.msk.f32.vlgmr.msra.gmra.mxu0 %vm102_vm1, %v1472_v63 }
 0xaec   :  { %4462 = vmatpush3.msra.mxu0 %v5204_v54  ;;  %4469 = vmatprep.mubr.msk.f32.mxu0 %vm5022_vm0, %v5021_v0 }
 0xaed   :  { %4463 = vmatprep.subr.mxu0 %v5021_v0 }
 0xaee   :  { %4464 = vmatpush3.msra.mxu0 %v5210_v56 }
 0xaef   :  { %4465 = vmatprep.subr.mxu0 %v5021_v0 }
 0xaf0   :  { %4466 = vmatpush3.msra.mxu0 %v5219_v57 }
 0xaf1   :  { %4467 = vmatprep.subr.mxu0 %v5021_v0 }
 0xaf2   :  { %4468 = vmatpush3.msra.mxu0 %v5226_v58 }
 0xaf3   :  { %4470 = vmatmul.mubr.msk.f32.vlgmr.msra.gmra.mxu0 %vm102_vm1, %v1472_v63  ;;  %4483 = vmatprep.subr.mxu0 %v5021_v0 }
 0xaf4   :  { %4484 = vmatpush3.msra.mxu0 %v5277_v43  ;;  %4491 = vmatprep.mubr.msk.f32.mxu0 %vm5022_vm0, %v5021_v0 }
 0xaf5   :  { %4485 = vmatprep.subr.mxu0 %v5021_v0 }
 0xaf6   :  { %4486 = vmatpush3.msra.mxu0 %v5287_v45 }
 0xaf7   :  { %4487 = vmatprep.subr.mxu0 %v5021_v0 }
 0xaf8   :  { %4488 = vmatpush3.msra.mxu0 %v5299_v52  ;;  %v1572_v3 = vpop.permute.xlu0 %1571 }
 0xaf9   :  { %4459 = vmatmul.mubr.msk.f32.vlgmr.msra.gmra.mxu1 %vm102_vm1, %v1572_v3  ;;  %4489 = vmatprep.subr.mxu0 %v5021_v0 }
 0xafa   :  { %4473 = vmatpush3.msra.mxu1 %v5282_v44  ;;  %4490 = vmatpush3.msra.mxu0 %v5310_v55 }
 0xafb   :  { %4474 = vmatprep.subr.mxu1 %v5021_v0  ;;  %4492 = vmatmul.mubr.msk.f32.vlgmr.msra.gmra.mxu0 %vm102_vm1, %v1572_v3 }
 0xafc   :  { %4475 = vmatpush3.msra.mxu1 %v5294_v48  ;;  %4480 = vmatprep.mubr.msk.f32.mxu1 %vm5022_vm0, %v5021_v0 }
 0xafd   :  { %4476 = vmatprep.subr.mxu1 %v5021_v0  ;;  %4505 = vmatprep.subr.mxu0 %v5021_v0 }
 0xafe   :  { %4477 = vmatpush3.msra.mxu1 %v5305_v53  ;;  %4506 = vmatpush3.msra.mxu0 %v5172_v47 }
 0xaff   :  { %4478 = vmatprep.subr.mxu1 %v5021_v0  ;;  %4507 = vmatprep.subr.mxu0 %v5021_v0 }
 0xb00   :  { %v1742_v4 = vpop.permute.xlu1 %1741  ;;  %4479 = vmatpush3.msra.mxu1 %v5316_v59  ;;  %4508 = vmatpush3.msra.mxu0 %v5177_v49 }
 0xb01   :  { %4481 = vmatmul.mubr.msk.f32.vlgmr.msra.gmra.mxu1 %vm102_vm1, %v1742_v4  ;;  %4494 = vmatprep.subr.mxu1 %v5021_v0 }
 0xb02   :  { %4495 = vmatpush3.msra.mxu1 %v5089_v5  ;;  %4502 = vmatprep.mubr.msk.f32.mxu1 %vm5022_vm0, %v5021_v0 }
 0xb03   :  { %4496 = vmatprep.subr.mxu1 %v5021_v0  ;;  %4509 = vmatprep.subr.mxu0 %v5021_v0 }
 0xb04   :  { %4497 = vmatpush3.msra.mxu1 %v5095_v7  ;;  %4510 = vmatpush3.msra.mxu0 %v5181_v50 }
 0xb05   :  { %4498 = vmatprep.subr.mxu1 %v5021_v0  ;;  %4511 = vmatprep.subr.mxu0 %v5021_v0 }
 0xb06   :  { %4499 = vmatpush3.msra.mxu1 %v5102_v9  ;;  %4512 = vmatpush3.msra.mxu0 %v5185_v51 }
 0xb07   :  { %4500 = vmatprep.subr.mxu1 %v5021_v0  ;;  %4513 = vmatprep.mubr.msk.f32.mxu0 %vm5022_vm0, %v5021_v0 }
 0xb08   :  { %4501 = vmatpush3.msra.mxu1 %v5117_v12  ;;  %4527 = vmatprep.subr.mxu0 %v5021_v0 }
 0xb09   :  { %4516 = vmatprep.subr.mxu1 %v5021_v0 }
 0xbab   :  { %v1541_v5 = vpop.f32.mrf.mxu0 }
 0xbac   :  { %v1545_v7 = vadd.f32 %v1541_v5, %v5161_v28 }
 0xbad   :  { %v4449_v47 = vpop.f32.mrf.mxu0 }
 0xbae   :  { %4850 = vtanh.f32 %v1545_v7  ;;  %v3988_v18 = vmul.f32 -1.442695, %v1545_v7 }
 0xbb3   :  { %v1711_v49 = vpop.f32.mrf.mxu0 }
 0xbb5   :  { %v4471_v9 = vpop.f32.mrf.mxu0 }
 0xbb9   :  { %v1641_v50 = vpop.f32.mrf.mxu1 }
 0xbba   :  { %v1712_v51 = vadd.f32 %v1711_v49, %v1641_v50 }
 0xbbb   :  { %v4851_v8 = vpop.eup %4850  ;;  %v4460_v10 = vpop.f32.mrf.mxu1 }
 0xbbc   :  { %v1881_v11 = vpop.f32.mrf.mxu0  ;;  %v1715_v31 = vadd.f32 %v5247_v1, %v1712_v51  ;;  %1555 = vrot.lane.b32.xlu0 %v4851_v8, %s5023_s0 }
 0xbbe   :  { %v4493_v12 = vpop.f32.mrf.mxu0  ;;  %4852 = vtanh.f32 %v1715_v31  ;;  %v3991_v19 = vmul.f32 -1.442695, %v1715_v31 }
 0xbc1   :  { %v1811_v14 = vpop.f32.mrf.mxu1 }
 0xbc2   :  { %v1882_v35 = vadd.f32 %v1881_v11, %v1811_v14 }
 0xbc3   :  { %v4482_v15 = vpop.f32.mrf.mxu1 }
 0xbc4   :  { %v1885_v28 = vadd.f32 %v5354_v13, %v1882_v35 }
 0xbc6   :  { %4854 = vtanh.f32 %v1885_v28  ;;  %v3994_v21 = vmul.f32 -1.442695, %v1885_v28 }
 0xbc7   :  { %4856 = vpow2.f32 %v3988_v18 }
 0xbc8   :  { %4858 = vpow2.f32 %v3991_v19 }
 0xbcb   :  { %v4853_v16 = vpop.eup %4852 }
 0xbcc   :  { %1725 = vrot.lane.b32.xlu1 %v4853_v16, %s5023_s0 }
 0xbd3   :  { %v4855_v17 = vpop.eup %4854 }
 0xbd4   :  { %1895 = vrot.lane.b32.xlu0 %v4855_v17, %s5023_s0  ;;  %v4857_v1 = vpop.eup %4856  ;;  %v5619_v17 = vld [vmem:[%s6018_s3 + $0x1] ss:$0 sm:$0xff] }
 0xbd5   :  { %v1549_v20 = vadd.f32 1.0, %v4857_v1  ;;  %v4859_v23 = vpop.eup %4858 }
 0xbd6   :  { %v1719_v25 = vadd.f32 1.0, %v4859_v23 }
 0xbd7   :  { %4860 = vrcp.f32 %v1549_v20 }
 0xbd8   :  { %4862 = vpow2.f32 %v3994_v21 }
 0xbd9   :  { %4864 = vrcp.f32 %v1719_v25 }
 0xbe4   :  { %v4861_v27 = vpop.eup %4860 }
 0xbe5   :  { %v4863_v36 = vpop.eup %4862  ;;  %v1553_v60 = vmul.f32 %v4861_v27, %v5444_v34 }
 0xbe6   :  { %v1889_v37 = vadd.f32 1.0, %v4863_v36  ;;  %v4865_v39 = vpop.eup %4864 }
 0xbe7   :  { %v1723_v24 = vmul.f32 %v4865_v39, %v5448_v38 }
 0xbe8   :  { %4866 = vrcp.f32 %v1889_v37 }
 0xbf5   :  { %v4867_v2 = vpop.eup %4866 }
 0xbf6   :  { %v1893_v4 = vmul.f32 %v4867_v2, %v5453_v42 }
 0xc2e   :  { %v1556_v29 = vpop.permute.xlu0 %1555 }
 0xc2f   :  { %v1558_v32 = vmul.f32 %v4861_v27, %v1556_v29 }
 0xc31   :  { %1560 = vrot.lane.b32.xlu1 %v1558_v32, %s5024_s15 }
 0xc3e   :  { %v1726_v40 = vpop.permute.xlu1 %1725 }
 0xc3f   :  { %v1728_v41 = vmul.f32 %v4865_v39, %v1726_v40 }
 0xc41   :  { %1730 = vrot.lane.b32.xlu0 %v1728_v41, %s5024_s15 }
 0xc46   :  { %v1896_v46 = vpop.permute.xlu0 %1895 }
 0xc47   :  { %v1898_v6 = vmul.f32 %v4867_v2, %v1896_v46 }
 0xc49   :  { %1900 = vrot.lane.b32.xlu1 %v1898_v6, %s5024_s15 }
 0xca3   :  { %v1561_v61 = vpop.permute.xlu1 %1560 }
 0xca4   :  { %v5526_v22 = vadd.f32 %v1561_v61, %v1553_v60 }
 0xca6   :  { %4868 = vtanh.f32 %v5526_v22 }
 0xcb3   :  { %v4869_v62 = vpop.eup %4868  ;;  %v1731_v63 = vpop.permute.xlu0 %1730 }
 0xcb4   :  { %v5530_v3 = vadd.f32 %v1731_v63, %v1723_v24  ;;  %1566 = vrot.lane.b32.xlu0 %v4869_v62, %s5023_s0 }
 0xcb6   :  { %4870 = vtanh.f32 %v5530_v3 }
 0xcbb   :  { %v1901_v5 = vpop.permute.xlu1 %1900 }
 0xcbc   :  { %v5535_v7 = vadd.f32 %v1901_v5, %v1893_v4 }
 0xcbe   :  { %4872 = vtanh.f32 %v5535_v7 }
 0xcc3   :  { %v4871_v34 = vpop.eup %4870 }
 0xcc4   :  { %1736 = vrot.lane.b32.xlu1 %v4871_v34, %s5023_s0 }
 0xccb   :  { %v4873_v47 = vpop.eup %4872 }
 0xccc   :  { %1906 = vrot.lane.b32.xlu0 %v4873_v47, %s5023_s0 }
 0xd26   :  { %v1567_v38 = vpop.permute.xlu0 %1566 }
 0xd27   :  { %v1569_v49 = vmul.f32 %v4861_v27, %v1567_v38 }
 0xd29   :  { %1911 = vrot.lane.b32.xlu1 %v1569_v49, %s5024_s15 }
 0xd36   :  { %v1737_v9 = vpop.permute.xlu1 %1736 }
 0xd37   :  { %v1739_v50 = vmul.f32 %v4865_v39, %v1737_v9 }
 0xd39   :  { %2011 = vrot.lane.b32.xlu0 %v1739_v50, %s5024_s15 }
 0xd3e   :  { %v1907_v42 = vpop.permute.xlu0 %1906 }
 0xd3f   :  { %v1909_v51 = vmul.f32 %v4867_v2, %v1907_v42 }
 0xd41   :  { %2181 = vrot.lane.b32.xlu1 %v1909_v51, %s5024_s15 }
 0xd9b   :  { %v1912_v8 = vpop.permute.xlu1 %1911 }
 0xd9c   :  { %4503 = vmatmul.mubr.msk.f32.vlgmr.msra.gmra.mxu1 %vm102_vm1, %v1912_v8 }
 0xd9d   :  { %4517 = vmatpush3.msra.mxu1 %v5204_v54  ;;  %4524 = vmatprep.mubr.msk.f32.mxu1 %vm5022_vm0, %v5021_v0 }
 0xd9e   :  { %4518 = vmatprep.subr.mxu1 %v5021_v0 }
 0xd9f   :  { %4519 = vmatpush3.msra.mxu1 %v5210_v56  ;;  %v5572_v56 = vld [vmem:[#allocation2 + $0x38] sm:$0xff] }
 0xda0   :  { %4520 = vmatprep.subr.mxu1 %v5021_v0 }
 0xda1   :  { %4521 = vmatpush3.msra.mxu1 %v5219_v57  ;;  %v5578_v57 = vld [vmem:[#allocation2 + $0x30] sm:$0xff] }
 0xda2   :  { %4522 = vmatprep.subr.mxu1 %v5021_v0 }
 0xda3   :  { %4523 = vmatpush3.msra.mxu1 %v5226_v58 }
 0xda4   :  { %4525 = vmatmul.mubr.msk.f32.vlgmr.msra.gmra.mxu1 %vm102_vm1, %v1912_v8  ;;  %4538 = vmatprep.subr.mxu1 %v5021_v0 }
 0xda5   :  { %4539 = vmatpush3.msra.mxu1 %v5277_v43  ;;  %4546 = vmatprep.mubr.msk.f32.mxu1 %vm5022_vm0, %v5021_v0  ;;  %v5584_v43 = vld [vmem:[#allocation2 + $0x28] sm:$0xff] }
 0xda6   :  { %4540 = vmatprep.subr.mxu1 %v5021_v0 }
 0xda7   :  { %4541 = vmatpush3.msra.mxu1 %v5287_v45  ;;  %v5596_v45 = vld [vmem:[#allocation2 + $0x10] sm:$0xff] }
 0xda8   :  { %4542 = vmatprep.subr.mxu1 %v5021_v0 }
 0xda9   :  { %4543 = vmatpush3.msra.mxu1 %v5299_v52  ;;  %v5605_v52 = vld [vmem:[#allocation2 + $0x8] sm:$0xff] }
 0xdaa   :  { %4544 = vmatprep.subr.mxu1 %v5021_v0 }
 0xdab   :  { %4545 = vmatpush3.msra.mxu1 %v5310_v55  ;;  %v2012_v54 = vpop.permute.xlu0 %2011 }
 0xdac   :  { %4514 = vmatmul.mubr.msk.f32.vlgmr.msra.gmra.mxu0 %vm102_vm1, %v2012_v54  ;;  %4547 = vmatmul.mubr.msk.f32.vlgmr.msra.gmra.mxu1 %vm102_vm1, %v2012_v54 }
 0xdad   :  { %4528 = vmatpush3.msra.mxu0 %v5282_v44  ;;  %4535 = vmatprep.mubr.msk.f32.mxu0 %vm5022_vm0, %v5021_v0  ;;  %v5589_v44 = vld [vmem:[#allocation2 + $0x18] sm:$0xff] }
 0xdae   :  { %4529 = vmatprep.subr.mxu0 %v5021_v0  ;;  %4560 = vmatprep.subr.mxu1 %v5021_v0 }
 0xdaf   :  { %4530 = vmatpush3.msra.mxu0 %v5294_v48  ;;  %4561 = vmatpush3.msra.mxu1 %v5572_v56  ;;  %v5599_v48 = vld [vmem:[#allocation2 + $0x20] sm:$0xff] }
 0xdb0   :  { %4531 = vmatprep.subr.mxu0 %v5021_v0  ;;  %4562 = vmatprep.subr.mxu1 %v5021_v0 }
 0xdb1   :  { %4532 = vmatpush3.msra.mxu0 %v5305_v53  ;;  %4563 = vmatpush3.msra.mxu1 %v5578_v57  ;;  %v5610_v53 = vld [vmem:[#allocation2] sm:$0xff] }
 0xdb2   :  { %4533 = vmatprep.subr.mxu0 %v5021_v0  ;;  %4564 = vmatprep.subr.mxu1 %v5021_v0 }
 0xdb3   :  { %v2182_v58 = vpop.permute.xlu1 %2181  ;;  %4534 = vmatpush3.msra.mxu0 %v5316_v59  ;;  %4565 = vmatpush3.msra.mxu1 %v5584_v43 }
 0xdb4   :  { %4536 = vmatmul.mubr.msk.f32.vlgmr.msra.gmra.mxu0 %vm102_vm1, %v2182_v58  ;;  %4549 = vmatprep.subr.mxu0 %v5021_v0 }
 0xdb5   :  { %4550 = vmatpush3.msra.mxu0 %v5589_v44  ;;  %4557 = vmatprep.mubr.msk.f32.mxu0 %vm5022_vm0, %v5021_v0 }
 0xdb6   :  { %4551 = vmatprep.subr.mxu0 %v5021_v0  ;;  %4566 = vmatprep.subr.mxu1 %v5021_v0 }
 0xdb7   :  { %4552 = vmatpush3.msra.mxu0 %v5596_v45  ;;  %4567 = vmatpush3.msra.mxu1 %v5599_v48 }
 0xdb8   :  { %4553 = vmatprep.subr.mxu0 %v5021_v0  ;;  %4568 = vmatprep.mubr.msk.f32.mxu1 %vm5022_vm0, %v5021_v0 }
 0xdb9   :  { %4554 = vmatpush3.msra.mxu0 %v5605_v52  ;;  %4582 = vmatprep.subr.mxu1 %v5021_v0 }
 0xdba   :  { %4555 = vmatprep.subr.mxu0 %v5021_v0 }
 0xdbb   :  { %4556 = vmatpush3.msra.mxu0 %v5610_v53 }
 0xdbc   :  { %4571 = vmatprep.subr.mxu0 %v5021_v0 }
 0xe5c   :  { %v1981_v55 = vpop.f32.mrf.mxu1 }
 0xe5d   :  { %v1985_v59 = vadd.f32 %v1981_v55, %v5159_v26 }
 0xe5e   :  { %v4504_v10 = vpop.f32.mrf.mxu1 }
 0xe5f   :  { %4874 = vtanh.f32 %v1985_v59  ;;  %v3996_v25 = vmul.f32 -1.442695, %v1985_v59 }
 0xe64   :  { %v2151_v11 = vpop.f32.mrf.mxu1 }
 0xe66   :  { %v4526_v31 = vpop.f32.mrf.mxu1 }
 0xe67   :  { %v5659_v31 = vld [vmem:[%s6016_s1 + $0x30] sm:$0xff] }
 0xe6c   :  { %v4875_v12 = vpop.eup %4874  ;;  %v2081_v14 = vpop.f32.mrf.mxu0 }
 0xe6d   :  { %v2321_v35 = vpop.f32.mrf.mxu1  ;;  %v2152_v15 = vadd.f32 %v2151_v11, %v2081_v14  ;;  %1995 = vrot.lane.b32.xlu0 %v4875_v12, %s5023_s0  ;;  %v5650_v11 = vld [vmem:[%s6016_s1 + $0x38] sm:$0xff]  ;;  %v5666_v12 = vld [vmem:[%s6016_s1 + $0x28] sm:$0xff]  ;;  %v5673_v14 = vld [vmem:[%s6016_s1 + $0x20] sm:$0xff] }
 0xe6e   :  { %v4515_v28 = vpop.f32.mrf.mxu0 }
 0xe6f   :  { %v4548_v16 = vpop.f32.mrf.mxu1  ;;  %v2155_v18 = vadd.f32 %v5619_v17, %v2152_v15  ;;  %v5690_v15 = vld [vmem:[%s6016_s1 + $0x50] sm:$0xff]  ;;  %v5697_v28 = vld [vmem:[%s6016_s1 + $0x48] sm:$0xff] }
 0xe70   :  { %v5704_v16 = vld [vmem:[%s6016_s1 + $0x40] sm:$0xff] }
 0xe71   :  { %4876 = vtanh.f32 %v2155_v18  ;;  %v3999_v29 = vmul.f32 -1.442695, %v2155_v18 }
 0xe74   :  { %v2251_v26 = vpop.f32.mrf.mxu0 }
 0xe75   :  { %v2322_v19 = vadd.f32 %v2321_v35, %v2251_v26  ;;  %v5681_v35 = vld [vmem:[%s6016_s1 + $0x58] sm:$0xff] }
 0xe76   :  { %v4537_v1 = vpop.f32.mrf.mxu0  ;;  %v5710_v26 = vld [vmem:[#allocation2 + $0x58] sm:$0xff] }
 0xe77   :  { %v2325_v20 = vadd.f32 %v5354_v13, %v2322_v19  ;;  %v5717_v19 = vld [vmem:[#allocation2 + $0x50] sm:$0xff]  ;;  %v5723_v1 = vld [vmem:[#allocation2 + $0x48] sm:$0xff] }
 0xe79   :  { %4878 = vtanh.f32 %v2325_v20  ;;  %v4002_v36 = vmul.f32 -1.442695, %v2325_v20 }
 0xe7a   :  { %4880 = vpow2.f32 %v3996_v25 }
 0xe7b   :  { %4882 = vpow2.f32 %v3999_v29 }
 0xe7e   :  { %v4877_v21 = vpop.eup %4876 }
 0xe7f   :  { %2165 = vrot.lane.b32.xlu1 %v4877_v21, %s5023_s0  ;;  %v5729_v21 = vld [vmem:[#allocation2 + $0x40] sm:$0xff] }
 0xe86   :  { %v4879_v23 = vpop.eup %4878 }
 0xe87   :  { %2335 = vrot.lane.b32.xlu0 %v4879_v23, %s5023_s0  ;;  %v4881_v27 = vpop.eup %4880 }
 0xe88   :  { %v1989_v32 = vadd.f32 1.0, %v4881_v27  ;;  %v4883_v37 = vpop.eup %4882 }
 0xe89   :  { %v2159_v41 = vadd.f32 1.0, %v4883_v37 }
 0xe8a   :  { %4884 = vrcp.f32 %v1989_v32 }
 0xe8b   :  { %4886 = vpow2.f32 %v4002_v36 }
 0xe8c   :  { %4888 = vrcp.f32 %v2159_v41 }
 0xe97   :  { %v4885_v39 = vpop.eup %4884 }
 0xe98   :  { %v4887_v2 = vpop.eup %4886  ;;  %v1993_v4 = vmul.f32 %v4885_v39, %v5526_v22 }
 0xe99   :  { %v2329_v46 = vadd.f32 1.0, %v4887_v2  ;;  %v4889_v6 = vpop.eup %4888 }
 0xe9a   :  { %v2163_v38 = vmul.f32 %v4889_v6, %v5530_v3 }
 0xe9b   :  { %4890 = vrcp.f32 %v2329_v46 }
 0xea8   :  { %v4891_v24 = vpop.eup %4890 }
 0xea9   :  { %v2333_v50 = vmul.f32 %v4891_v24, %v5535_v7 }
 0xedf   :  { %v1996_v40 = vpop.permute.xlu0 %1995 }
 0xee0   :  { %v1998_v13 = vmul.f32 %v4885_v39, %v1996_v40 }
 0xee2   :  { %2000 = vrot.lane.b32.xlu1 %v1998_v13, %s5024_s15 }
 0xef1   :  { %v2166_v60 = vpop.permute.xlu1 %2165 }
 0xef2   :  { %v2168_v61 = vmul.f32 %v4889_v6, %v2166_v60 }
 0xef4   :  { %2170 = vrot.lane.b32.xlu0 %v2168_v61, %s5024_s15 }
 0xef9   :  { %v2336_v62 = vpop.permute.xlu0 %2335 }
 0xefa   :  { %v2338_v63 = vmul.f32 %v4891_v24, %v2336_v62 }
 0xefc   :  { %2340 = vrot.lane.b32.xlu1 %v2338_v63, %s5024_s15 }
 0xf54   :  { %v2001_v5 = vpop.permute.xlu1 %2000 }
 0xf55   :  { %v5629_v34 = vadd.f32 %v2001_v5, %v1993_v4 }
 0xf57   :  { %4892 = vtanh.f32 %v5629_v34 }
 0xf64   :  { %v4893_v47 = vpop.eup %4892 }
 0xf65   :  { %2006 = vrot.lane.b32.xlu0 %v4893_v47, %s5023_s0 }
 0xf66   :  { %v2171_v49 = vpop.permute.xlu0 %2170 }
 0xf67   :  { %v5634_v9 = vadd.f32 %v2171_v49, %v2163_v38 }
 0xf69   :  { %4894 = vtanh.f32 %v5634_v9 }
 0xf6e   :  { %v2341_v42 = vpop.permute.xlu1 %2340 }
 0xf6f   :  { %v5638_v51 = vadd.f32 %v2341_v42, %v2333_v50 }
 0xf71   :  { %4896 = vtanh.f32 %v5638_v51 }
 0xf76   :  { %v4895_v22 = vpop.eup %4894 }
 0xf77   :  { %2176 = vrot.lane.b32.xlu1 %v4895_v22, %s5023_s0 }
 0xf7e   :  { %v4897_v8 = vpop.eup %4896 }
 0xf7f   :  { %2346 = vrot.lane.b32.xlu0 %v4897_v8, %s5023_s0 }
 0xfd7   :  { %v2007_v54 = vpop.permute.xlu0 %2006 }
 0xfd8   :  { %v2009_v3 = vmul.f32 %v4885_v39, %v2007_v54 }
 0xfda   :  { %2351 = vrot.lane.b32.xlu1 %v2009_v3, %s5024_s15 }
 0xfe9   :  { %v2177_v58 = vpop.permute.xlu1 %2176 }
 0xfea   :  { %v2179_v55 = vmul.f32 %v4889_v6, %v2177_v58 }
 0xfec   :  { %2451 = vrot.lane.b32.xlu0 %v2179_v55, %s5024_s15 }
 0xff1   :  { %v2347_v7 = vpop.permute.xlu0 %2346 }
 0xff2   :  { %v2349_v59 = vmul.f32 %v4891_v24, %v2347_v7 }
 0xff4   :  { %2621 = vrot.lane.b32.xlu1 %v2349_v59, %s5024_s15 }
0x104c   :  { %v2352_v10 = vpop.permute.xlu1 %2351 }
0x104d   :  { %4558 = vmatmul.mubr.msk.f32.vlgmr.msra.gmra.mxu0 %vm102_vm1, %v2352_v10 }
0x104e   :  { %4572 = vmatpush3.msra.mxu0 %v5650_v11  ;;  %4579 = vmatprep.mubr.msk.f32.mxu0 %vm5022_vm0, %v5021_v0 }
0x104f   :  { %4573 = vmatprep.subr.mxu0 %v5021_v0 }
0x1050   :  { %4574 = vmatpush3.msra.mxu0 %v5659_v31 }
0x1051   :  { %4575 = vmatprep.subr.mxu0 %v5021_v0 }
0x1052   :  { %4576 = vmatpush3.msra.mxu0 %v5666_v12 }
0x1053   :  { %4577 = vmatprep.subr.mxu0 %v5021_v0 }
0x1054   :  { %4578 = vmatpush3.msra.mxu0 %v5673_v14 }
0x1055   :  { %4580 = vmatmul.mubr.msk.f32.vlgmr.msra.gmra.mxu0 %vm102_vm1, %v2352_v10  ;;  %4593 = vmatprep.subr.mxu0 %v5021_v0 }
0x1056   :  { %4594 = vmatpush3.msra.mxu0 %v5681_v35  ;;  %4601 = vmatprep.mubr.msk.f32.mxu0 %vm5022_vm0, %v5021_v0 }
0x1057   :  { %4595 = vmatprep.subr.mxu0 %v5021_v0 }
0x1058   :  { %4596 = vmatpush3.msra.mxu0 %v5690_v15 }
0x1059   :  { %4597 = vmatprep.subr.mxu0 %v5021_v0 }
0x105a   :  { %4598 = vmatpush3.msra.mxu0 %v5697_v28 }
0x105b   :  { %4599 = vmatprep.subr.mxu0 %v5021_v0 }
0x105c   :  { %4600 = vmatpush3.msra.mxu0 %v5704_v16 }
0x105d   :  { %4615 = vmatprep.subr.mxu0 %v5021_v0 }
0x105e   :  { %v2452_v18 = vpop.permute.xlu0 %2451 }
0x105f   :  { %4569 = vmatmul.mubr.msk.f32.vlgmr.msra.gmra.mxu1 %vm102_vm1, %v2452_v18  ;;  %4602 = vmatmul.mubr.msk.f32.vlgmr.msra.gmra.mxu0 %vm102_vm1, %v2452_v18 }
0x1060   :  { %4583 = vmatpush3.msra.mxu1 %v5710_v26  ;;  %4590 = vmatprep.mubr.msk.f32.mxu1 %vm5022_vm0, %v5021_v0 }
0x1061   :  { %4584 = vmatprep.subr.mxu1 %v5021_v0  ;;  %4616 = vmatpush3.msra.mxu0 %v5572_v56 }
0x1062   :  { %4585 = vmatpush3.msra.mxu1 %v5717_v19  ;;  %4617 = vmatprep.subr.mxu0 %v5021_v0 }
0x1063   :  { %4586 = vmatprep.subr.mxu1 %v5021_v0  ;;  %4618 = vmatpush3.msra.mxu0 %v5578_v57 }
0x1064   :  { %4587 = vmatpush3.msra.mxu1 %v5723_v1  ;;  %4619 = vmatprep.subr.mxu0 %v5021_v0 }
0x1065   :  { %4588 = vmatprep.subr.mxu1 %v5021_v0  ;;  %4620 = vmatpush3.msra.mxu0 %v5584_v43 }
0x1066   :  { %v2622_v20 = vpop.permute.xlu1 %2621  ;;  %4589 = vmatpush3.msra.mxu1 %v5729_v21  ;;  %4621 = vmatprep.subr.mxu0 %v5021_v0 }
0x1067   :  { %4591 = vmatmul.mubr.msk.f32.vlgmr.msra.gmra.mxu1 %vm102_vm1, %v2622_v20  ;;  %4604 = vmatprep.subr.mxu1 %v5021_v0 }
0x1068   :  { %4605 = vmatpush3.msra.mxu1 %v5589_v44  ;;  %4612 = vmatprep.mubr.msk.f32.mxu1 %vm5022_vm0, %v5021_v0 }
0x1069   :  { %4606 = vmatprep.subr.mxu1 %v5021_v0  ;;  %4622 = vmatpush3.msra.mxu0 %v5599_v48 }
0x106a   :  { %4607 = vmatpush3.msra.mxu1 %v5596_v45  ;;  %4623 = vmatprep.mubr.msk.f32.mxu0 %vm5022_vm0, %v5021_v0 }
0x106b   :  { %4608 = vmatprep.subr.mxu1 %v5021_v0  ;;  %4637 = vmatprep.subr.mxu0 %v5021_v0 }
0x106c   :  { %4609 = vmatpush3.msra.mxu1 %v5605_v52 }
0x106d   :  { %4610 = vmatprep.subr.mxu1 %v5021_v0 }
0x106e   :  { %4611 = vmatpush3.msra.mxu1 %v5610_v53 }
0x106f   :  { %4626 = vmatprep.subr.mxu1 %v5021_v0 }
0x110d   :  { %v2421_v44 = vpop.f32.mrf.mxu0 }
0x110e   :  { %v2425_v23 = vadd.f32 %v2421_v44, %v5165_v33  ;;  %v5755_v33 = vld [vmem:[%s6018_s3 + $0x2] ss:$0 sm:$0xff] }
0x110f   :  { %v4559_v25 = vpop.f32.mrf.mxu0 }
0x1110   :  { %4898 = vtanh.f32 %v2425_v23  ;;  %v4004_v60 = vmul.f32 -1.442695, %v2425_v23 }
0x1115   :  { %v2591_v45 = vpop.f32.mrf.mxu0 }
0x1117   :  { %v4581_v27 = vpop.f32.mrf.mxu0 }
0x111d   :  { %v4899_v29 = vpop.eup %4898 }
0x111e   :  { %2435 = vrot.lane.b32.xlu0 %v4899_v29, %s5023_s0 }
0x111f   :  { %v2521_v32 = vpop.f32.mrf.mxu1  ;;  %v2761_v36 = vpop.f32.mrf.mxu0 }
0x1120   :  { %v2592_v37 = vadd.f32 %v2591_v45, %v2521_v32 }
0x1121   :  { %v4570_v52 = vpop.f32.mrf.mxu1  ;;  %v4603_v39 = vpop.f32.mrf.mxu0 }
0x1122   :  { %v2595_v40 = vadd.f32 %v5619_v17, %v2592_v37 }
0x1124   :  { %4900 = vtanh.f32 %v2595_v40  ;;  %v4007_v62 = vmul.f32 -1.442695, %v2595_v40 }
0x1127   :  { %v2691_v53 = vpop.f32.mrf.mxu1 }
0x1128   :  { %v2762_v13 = vadd.f32 %v2761_v36, %v2691_v53 }
0x1129   :  { %v4592_v41 = vpop.f32.mrf.mxu1 }
0x112a   :  { %v2765_v2 = vadd.f32 %v5755_v33, %v2762_v13 }
0x112c   :  { %4902 = vtanh.f32 %v2765_v2  ;;  %v4010_v63 = vmul.f32 -1.442695, %v2765_v2 }
0x112d   :  { %4904 = vpow2.f32 %v4004_v60 }
0x1131   :  { %v4901_v46 = vpop.eup %4900 }
0x1132   :  { %2605 = vrot.lane.b32.xlu1 %v4901_v46, %s5023_s0 }
0x1139   :  { %v4903_v6 = vpop.eup %4902 }
0x113a   :  { %2775 = vrot.lane.b32.xlu0 %v4903_v6, %s5023_s0  ;;  %v4905_v61 = vpop.eup %4904 }
0x113b   :  { %v2429_v24 = vadd.f32 1.0, %v4905_v61 }
0x113d   :  { %4906 = vrcp.f32 %v2429_v24 }
0x113e   :  { %4908 = vpow2.f32 %v4007_v62 }
0x113f   :  { %4910 = vpow2.f32 %v4010_v63 }
0x114a   :  { %v4907_v4 = vpop.eup %4906 }
0x114b   :  { %v4909_v47 = vpop.eup %4908  ;;  %v2433_v7 = vmul.f32 %v4907_v4, %v5629_v34 }
0x114c   :  { %v2599_v49 = vadd.f32 1.0, %v4909_v47  ;;  %v4911_v50 = vpop.eup %4910 }
0x114d   :  { %v2769_v42 = vadd.f32 1.0, %v4911_v50 }
0x114e   :  { %4912 = vrcp.f32 %v2599_v49 }
0x114f   :  { %4914 = vrcp.f32 %v2769_v42 }
0x115b   :  { %v4913_v22 = vpop.eup %4912 }
0x115c   :  { %v4915_v3 = vpop.eup %4914  ;;  %v2603_v20 = vmul.f32 %v4913_v22, %v5634_v9 }
0x115d   :  { %v2773_v25 = vmul.f32 %v4915_v3, %v5638_v51 }
0x1190   :  { %v2436_v5 = vpop.permute.xlu0 %2435 }
0x1191   :  { %v2438_v38 = vmul.f32 %v4907_v4, %v2436_v5 }
0x1193   :  { %2440 = vrot.lane.b32.xlu1 %v2438_v38, %s5024_s15 }
0x11a4   :  { %v2606_v8 = vpop.permute.xlu1 %2605 }
0x11a5   :  { %v2608_v54 = vmul.f32 %v4913_v22, %v2606_v8 }
0x11a7   :  { %2610 = vrot.lane.b32.xlu0 %v2608_v54, %s5024_s15 }
0x11ac   :  { %v2776_v58 = vpop.permute.xlu0 %2775 }
0x11ad   :  { %v2778_v55 = vmul.f32 %v4915_v3, %v2776_v58 }
0x11af   :  { %2780 = vrot.lane.b32.xlu1 %v2778_v55, %s5024_s15 }
0x1205   :  { %v2441_v59 = vpop.permute.xlu1 %2440 }
0x1206   :  { %v5764_v10 = vadd.f32 %v2441_v59, %v2433_v7 }
0x1208   :  { %4916 = vtanh.f32 %v5764_v10 }
0x1215   :  { %v4917_v18 = vpop.eup %4916 }
0x1216   :  { %2446 = vrot.lane.b32.xlu0 %v4917_v18, %s5023_s0 }
0x1219   :  { %v2611_v44 = vpop.permute.xlu0 %2610 }
0x121a   :  { %v5769_v23 = vadd.f32 %v2611_v44, %v2603_v20 }
0x121c   :  { %4918 = vtanh.f32 %v5769_v23 }
0x1221   :  { %v2781_v45 = vpop.permute.xlu1 %2780 }
0x1222   :  { %v5773_v27 = vadd.f32 %v2781_v45, %v2773_v25 }
0x1224   :  { %4920 = vtanh.f32 %v5773_v27 }
0x1229   :  { %v4919_v34 = vpop.eup %4918 }
0x122a   :  { %2616 = vrot.lane.b32.xlu1 %v4919_v34, %s5023_s0 }
0x1231   :  { %v4921_v29 = vpop.eup %4920 }
0x1232   :  { %2786 = vrot.lane.b32.xlu0 %v4921_v29, %s5023_s0 }
0x1288   :  { %v2447_v32 = vpop.permute.xlu0 %2446 }
0x1289   :  { %v2449_v9 = vmul.f32 %v4907_v4, %v2447_v32 }
0x128b   :  { %2791 = vrot.lane.b32.xlu1 %v2449_v9, %s5024_s15 }
0x129c   :  { %v2617_v36 = vpop.permute.xlu1 %2616 }
0x129d   :  { %v2619_v37 = vmul.f32 %v4913_v22, %v2617_v36 }
0x129f   :  { %2891 = vrot.lane.b32.xlu0 %v2619_v37, %s5024_s15 }
0x12a4   :  { %v2787_v51 = vpop.permute.xlu0 %2786 }
0x12a5   :  { %v2789_v52 = vmul.f32 %v4915_v3, %v2787_v51 }
0x12a7   :  { %3061 = vrot.lane.b32.xlu1 %v2789_v52, %s5024_s15 }
0x12fd   :  { %v2792_v39 = vpop.permute.xlu1 %2791 }
0x12fe   :  { %4613 = vmatmul.mubr.msk.f32.vlgmr.msra.gmra.mxu1 %vm102_vm1, %v2792_v39 }
0x12ff   :  { %4627 = vmatpush3.msra.mxu1 %v5650_v11  ;;  %4634 = vmatprep.mubr.msk.f32.mxu1 %vm5022_vm0, %v5021_v0 }
0x1300   :  { %4628 = vmatprep.subr.mxu1 %v5021_v0 }
0x1301   :  { %4629 = vmatpush3.msra.mxu1 %v5659_v31 }
0x1302   :  { %4630 = vmatprep.subr.mxu1 %v5021_v0 }
0x1303   :  { %4631 = vmatpush3.msra.mxu1 %v5666_v12 }
0x1304   :  { %4632 = vmatprep.subr.mxu1 %v5021_v0 }
0x1305   :  { %4633 = vmatpush3.msra.mxu1 %v5673_v14 }
0x1306   :  { %4635 = vmatmul.mubr.msk.f32.vlgmr.msra.gmra.mxu1 %vm102_vm1, %v2792_v39  ;;  %4648 = vmatprep.subr.mxu1 %v5021_v0 }
0x1307   :  { %4649 = vmatpush3.msra.mxu1 %v5681_v35  ;;  %4656 = vmatprep.mubr.msk.f32.mxu1 %vm5022_vm0, %v5021_v0 }
0x1308   :  { %4650 = vmatprep.subr.mxu1 %v5021_v0 }
0x1309   :  { %4651 = vmatpush3.msra.mxu1 %v5690_v15 }
0x130a   :  { %4652 = vmatprep.subr.mxu1 %v5021_v0 }
0x130b   :  { %4653 = vmatpush3.msra.mxu1 %v5697_v28 }
0x130c   :  { %4654 = vmatprep.subr.mxu1 %v5021_v0 }
0x130d   :  { %4655 = vmatpush3.msra.mxu1 %v5704_v16 }
0x130e   :  { %4670 = vmatprep.subr.mxu1 %v5021_v0 }
0x1311   :  { %v2892_v40 = vpop.permute.xlu0 %2891 }
0x1312   :  { %4624 = vmatmul.mubr.msk.f32.vlgmr.msra.gmra.mxu0 %vm102_vm1, %v2892_v40  ;;  %4657 = vmatmul.mubr.msk.f32.vlgmr.msra.gmra.mxu1 %vm102_vm1, %v2892_v40 }
0x1313   :  { %4638 = vmatpush3.msra.mxu0 %v5710_v26  ;;  %4645 = vmatprep.mubr.msk.f32.mxu0 %vm5022_vm0, %v5021_v0 }
0x1314   :  { %4639 = vmatprep.subr.mxu0 %v5021_v0  ;;  %4671 = vmatpush3.msra.mxu1 %v5650_v11 }
0x1315   :  { %4640 = vmatpush3.msra.mxu0 %v5717_v19  ;;  %4672 = vmatprep.subr.mxu1 %v5021_v0 }
0x1316   :  { %4641 = vmatprep.subr.mxu0 %v5021_v0  ;;  %4673 = vmatpush3.msra.mxu1 %v5659_v31 }
0x1317   :  { %4642 = vmatpush3.msra.mxu0 %v5723_v1  ;;  %4674 = vmatprep.subr.mxu1 %v5021_v0 }
0x1318   :  { %4643 = vmatprep.subr.mxu0 %v5021_v0  ;;  %4675 = vmatpush3.msra.mxu1 %v5666_v12 }
0x1319   :  { %v3062_v53 = vpop.permute.xlu1 %3061  ;;  %4644 = vmatpush3.msra.mxu0 %v5729_v21  ;;  %4676 = vmatprep.subr.mxu1 %v5021_v0 }
0x131a   :  { %4646 = vmatmul.mubr.msk.f32.vlgmr.msra.gmra.mxu0 %vm102_vm1, %v3062_v53  ;;  %4677 = vmatpush3.msra.mxu1 %v5673_v14 }
0x131b   :  { %4678 = vmatprep.mubr.msk.f32.mxu1 %vm5022_vm0, %v5021_v0  ;;  %4659 = vmatprep.subr.mxu0 %v5021_v0 }
0x131c   :  { %4660 = vmatpush3.msra.mxu0 %v5572_v56  ;;  %4692 = vmatprep.subr.mxu1 %v5021_v0 }
0x131d   :  { %4661 = vmatprep.subr.mxu0 %v5021_v0  ;;  %4667 = vmatprep.mubr.msk.f32.mxu0 %vm5022_vm0, %v5021_v0 }
0x131e   :  { %4662 = vmatpush3.msra.mxu0 %v5578_v57 }
0x131f   :  { %4663 = vmatprep.subr.mxu0 %v5021_v0 }
0x1320   :  { %4664 = vmatpush3.msra.mxu0 %v5584_v43 }
0x1321   :  { %4665 = vmatprep.subr.mxu0 %v5021_v0 }
0x1322   :  { %4666 = vmatpush3.msra.mxu0 %v5599_v48 }
0x1323   :  { %4681 = vmatprep.subr.mxu0 %v5021_v0 }
0x13be   :  { %v2861_v56 = vpop.f32.mrf.mxu1 }
0x13bf   :  { %v2865_v11 = vadd.f32 %v2861_v56, %v5163_v30 }
0x13c0   :  { %v4614_v31 = vpop.f32.mrf.mxu1 }
0x13c1   :  { %4922 = vtanh.f32 %v2865_v11  ;;  %v4012_v63 = vmul.f32 -1.442695, %v2865_v11 }
0x13c6   :  { %v3031_v12 = vpop.f32.mrf.mxu1 }
0x13c8   :  { %v4636_v14 = vpop.f32.mrf.mxu1 }
0x13ce   :  { %v4923_v13 = vpop.eup %4922 }
0x13cf   :  { %2875 = vrot.lane.b32.xlu0 %v4923_v13, %s5023_s0 }
0x13d2   :  { %v2961_v57 = vpop.f32.mrf.mxu0  ;;  %v3201_v41 = vpop.f32.mrf.mxu1 }
0x13d3   :  { %v3032_v2 = vadd.f32 %v3031_v12, %v2961_v57 }
0x13d4   :  { %v4625_v43 = vpop.f32.mrf.mxu0  ;;  %v4658_v46 = vpop.f32.mrf.mxu1 }
0x13d5   :  { %v3035_v6 = vadd.f32 %v5619_v17, %v3032_v2 }
0x13d7   :  { %4924 = vtanh.f32 %v3035_v6  ;;  %v4015_v47 = vmul.f32 -1.442695, %v3035_v6 }
0x13da   :  { %v3131_v48 = vpop.f32.mrf.mxu0 }
0x13db   :  { %v3202_v60 = vadd.f32 %v3201_v41, %v3131_v48 }
0x13dc   :  { %v4647_v61 = vpop.f32.mrf.mxu0 }
0x13dd   :  { %v3205_v30 = vadd.f32 %v5755_v33, %v3202_v60 }
0x13df   :  { %4926 = vtanh.f32 %v3205_v30  ;;  %v4018_v38 = vmul.f32 -1.442695, %v3205_v30 }
0x13e0   :  { %4928 = vpow2.f32 %v4012_v63 }
0x13e4   :  { %v4925_v24 = vpop.eup %4924 }
0x13e5   :  { %3045 = vrot.lane.b32.xlu1 %v4925_v24, %s5023_s0 }
0x13ec   :  { %v4927_v62 = vpop.eup %4926 }
0x13ed   :  { %3215 = vrot.lane.b32.xlu0 %v4927_v62, %s5023_s0  ;;  %v4929_v4 = vpop.eup %4928 }
0x13ee   :  { %v2869_v5 = vadd.f32 1.0, %v4929_v4 }
0x13f0   :  { %4930 = vrcp.f32 %v2869_v5 }
0x13f1   :  { %4932 = vpow2.f32 %v4015_v47 }
0x13f2   :  { %4934 = vpow2.f32 %v4018_v38 }
0x13fd   :  { %v4931_v49 = vpop.eup %4930 }
0x13fe   :  { %v4933_v22 = vpop.eup %4932  ;;  %v2873_v44 = vmul.f32 %v4931_v49, %v5764_v10 }
0x13ff   :  { %v3039_v8 = vadd.f32 1.0, %v4933_v22  ;;  %v4935_v54 = vpop.eup %4934 }
0x1400   :  { %v3209_v3 = vadd.f32 1.0, %v4935_v54 }
0x1401   :  { %4936 = vrcp.f32 %v3039_v8 }
0x1402   :  { %4938 = vrcp.f32 %v3209_v3 }
0x140e   :  { %v4937_v58 = vpop.eup %4936 }
0x140f   :  { %v4939_v59 = vpop.eup %4938  ;;  %v3043_v29 = vmul.f32 %v4937_v58, %v5769_v23 }
0x1410   :  { %v3213_v36 = vmul.f32 %v4939_v59, %v5773_v27 }
0x1441   :  { %v2876_v50 = vpop.permute.xlu0 %2875 }
0x1442   :  { %v2878_v42 = vmul.f32 %v4931_v49, %v2876_v50 }
0x1444   :  { %2880 = vrot.lane.b32.xlu1 %v2878_v42, %s5024_s15 }
0x1457   :  { %v3046_v55 = vpop.permute.xlu1 %3045 }
0x1458   :  { %v3048_v7 = vmul.f32 %v4937_v58, %v3046_v55 }
0x145a   :  { %3050 = vrot.lane.b32.xlu0 %v3048_v7, %s5024_s15 }
0x145f   :  { %v3216_v18 = vpop.permute.xlu0 %3215 }
0x1460   :  { %v3218_v20 = vmul.f32 %v4939_v59, %v3216_v18 }
0x1462   :  { %3220 = vrot.lane.b32.xlu1 %v3218_v20, %s5024_s15 }
0x14b6   :  { %v2881_v25 = vpop.permute.xlu1 %2880 }
0x14b7   :  { %v2883_v45 = vadd.f32 %v2881_v25, %v2873_v44 }
0x14b9   :  { %4940 = vtanh.f32 %v2883_v45 }
0x14c6   :  { %v4941_v34 = vpop.eup %4940 }
0x14c7   :  { %2886 = vrot.lane.b32.xlu0 %v4941_v34, %s5023_s0 }
0x14cc   :  { %v3051_v32 = vpop.permute.xlu0 %3050 }
0x14cd   :  { %v5848_v9 = vadd.f32 %v3051_v32, %v3043_v29 }
0x14cf   :  { %4942 = vtanh.f32 %v5848_v9 }
0x14d4   :  { %v3221_v37 = vpop.permute.xlu1 %3220 }
0x14d5   :  { %v5852_v51 = vadd.f32 %v3221_v37, %v3213_v36 }
0x14d7   :  { %4944 = vtanh.f32 %v5852_v51 }
0x14dc   :  { %v4943_v10 = vpop.eup %4942 }
0x14dd   :  { %3056 = vrot.lane.b32.xlu1 %v4943_v10, %s5023_s0 }
0x14e4   :  { %v4945_v52 = vpop.eup %4944 }
0x14e5   :  { %3226 = vrot.lane.b32.xlu0 %v4945_v52, %s5023_s0 }
0x1539   :  { %v2887_v39 = vpop.permute.xlu0 %2886 }
0x153a   :  { %v2889_v23 = vmul.f32 %v4931_v49, %v2887_v39 }
0x153c   :  { %3306 = vrot.lane.b32.xlu0 %v2889_v23, %s5024_s15 }
0x154f   :  { %v3057_v40 = vpop.permute.xlu1 %3056 }
0x1550   :  { %v3059_v53 = vmul.f32 %v4937_v58, %v3057_v40 }
0x1552   :  { %3231 = vrot.lane.b32.xlu1 %v3059_v53, %s5024_s15  ;;  %v3752_v53 = vld [vmem:[%s6019_s4 + $0x10] sm:$0xff] }
0x1557   :  { %v3227_v27 = vpop.permute.xlu0 %3226 }
0x1558   :  { %v3229_v56 = vmul.f32 %v4939_v59, %v3227_v27  ;;  %v3751_v27 = vld [vmem:[%s6019_s4 + $0x8] sm:$0xff] }
0x155a   :  { %3406 = vrot.lane.b32.xlu1 %v3229_v56, %s5024_s15  ;;  %v3750_v56 = vld [vmem:[%s6019_s4] sm:$0xff] }
0x15ae   :  { %v3307_v11 = vpop.permute.xlu0 %3306 }
0x15af   :  { %4679 = vmatmul.mubr.msk.f32.vlgmr.msra.gmra.mxu1 %vm102_vm1, %v3307_v11 }
0x15b0   :  { %4693 = vmatpush3.msra.mxu1 %v5681_v35  ;;  %4700 = vmatprep.mubr.msk.f32.mxu1 %vm5022_vm0, %v5021_v0 }
0x15b1   :  { %4694 = vmatprep.subr.mxu1 %v5021_v0 }
0x15b2   :  { %4695 = vmatpush3.msra.mxu1 %v5690_v15 }
0x15b3   :  { %4696 = vmatprep.subr.mxu1 %v5021_v0 }
0x15b4   :  { %4697 = vmatpush3.msra.mxu1 %v5697_v28 }
0x15b5   :  { %4698 = vmatprep.subr.mxu1 %v5021_v0 }
0x15b6   :  { %4699 = vmatpush3.msra.mxu1 %v5704_v16 }
0x15b7   :  { %4714 = vmatprep.subr.mxu1 %v5021_v0 }
0x15c4   :  { %v3232_v31 = vpop.permute.xlu1 %3231 }
0x15c5   :  { %4668 = vmatmul.mubr.msk.f32.vlgmr.msra.gmra.mxu0 %vm102_vm1, %v3232_v31  ;;  %4701 = vmatmul.mubr.msk.f32.vlgmr.msra.gmra.mxu1 %vm102_vm1, %v3232_v31  ;;  %v3852_v31 = vld [vmem:[%s6021_s6 + $0x78] sm:$0xff] }
0x15c6   :  { %4682 = vmatpush3.msra.mxu0 %v5710_v26  ;;  %4689 = vmatprep.mubr.msk.f32.mxu0 %vm5022_vm0, %v5021_v0 }
0x15c7   :  { %4683 = vmatprep.subr.mxu0 %v5021_v0  ;;  %4715 = vmatpush3.msra.mxu1 %v5681_v35 }
0x15c8   :  { %4684 = vmatpush3.msra.mxu0 %v5717_v19  ;;  %4716 = vmatprep.subr.mxu1 %v5021_v0 }
0x15c9   :  { %4685 = vmatprep.subr.mxu0 %v5021_v0  ;;  %4717 = vmatpush3.msra.mxu1 %v5690_v15 }
0x15ca   :  { %4686 = vmatpush3.msra.mxu0 %v5723_v1  ;;  %4718 = vmatprep.subr.mxu1 %v5021_v0 }
0x15cb   :  { %4687 = vmatprep.subr.mxu0 %v5021_v0  ;;  %4719 = vmatpush3.msra.mxu1 %v5697_v28 }
0x15cc   :  { %4688 = vmatpush3.msra.mxu0 %v5729_v21  ;;  %v3407_v12 = vpop.permute.xlu1 %3406  ;;  %4720 = vmatprep.subr.mxu1 %v5021_v0 }
0x15cd   :  { %4690 = vmatmul.mubr.msk.f32.vlgmr.msra.gmra.mxu0 %vm102_vm1, %v3407_v12  ;;  %4703 = vmatprep.subr.mxu0 %v5021_v0  ;;  %v3851_v12 = vld [vmem:[%s6021_s6 + $0x70] sm:$0xff] }
0x15ce   :  { %4721 = vmatpush3.msra.mxu1 %v5704_v16  ;;  %4722 = vmatprep.mubr.msk.f32.mxu1 %vm5022_vm0, %v5021_v0 }
0x15cf   :  { %4704 = vmatpush3.msra.mxu0 %v5710_v26  ;;  %4711 = vmatprep.mubr.msk.f32.mxu0 %vm5022_vm0, %v5021_v0 }
0x15d0   :  { %4705 = vmatprep.subr.mxu0 %v5021_v0  ;;  %4736 = vmatprep.subr.mxu1 %v5021_v0 }
0x15d1   :  { %4706 = vmatpush3.msra.mxu0 %v5717_v19 }
0x15d2   :  { %4707 = vmatprep.subr.mxu0 %v5021_v0 }
0x15d3   :  { %4708 = vmatpush3.msra.mxu0 %v5723_v1 }
0x15d4   :  { %4709 = vmatprep.subr.mxu0 %v5021_v0 }
0x15d5   :  { %4710 = vmatpush3.msra.mxu0 %v5729_v21 }
0x15d6   :  { %4725 = vmatprep.subr.mxu0 %v5021_v0 }
0x166f   :  { %v3376_v35 = vpop.f32.mrf.mxu1 }
0x1671   :  { %v4680_v15 = vpop.f32.mrf.mxu1 }
0x1672   :  { %v3849_v15 = vld [vmem:[%s6021_s6 + $0x60] sm:$0xff] }
0x1685   :  { %v3301_v28 = vpop.f32.mrf.mxu0  ;;  %v3546_v16 = vpop.f32.mrf.mxu1 }
0x1686   :  { %v3377_v26 = vadd.f32 %v3376_v35, %v3301_v28  ;;  %v3850_v35 = vld [vmem:[%s6021_s6 + $0x68] sm:$0xff]  ;;  %v3848_v28 = vld [vmem:[%s6021_s6 + $0x58] sm:$0xff] }
0x1687   :  { %v4669_v14 = vpop.f32.mrf.mxu0  ;;  %v4702_v13 = vpop.f32.mrf.mxu1 }
0x1688   :  { %v3380_v57 = vadd.f32 %v5619_v17, %v3377_v26  ;;  %v3846_v14 = vld [vmem:[%s6021_s6 + $0x48] sm:$0xff] }
0x168a   :  { %4946 = vtanh.f32 %v3380_v57  ;;  %v4021_v46 = vmul.f32 -1.442695, %v3380_v57  ;;  %v3845_v57 = vld [vmem:[%s6021_s6 + $0x40] sm:$0xff] }
0x168d   :  { %v3476_v19 = vpop.f32.mrf.mxu0 }
0x168e   :  { %v3547_v41 = vadd.f32 %v3546_v16, %v3476_v19  ;;  %v3847_v16 = vld [vmem:[%s6021_s6 + $0x50] sm:$0xff]  ;;  %v3844_v19 = vld [vmem:[%s6021_s6 + $0x38] sm:$0xff] }
0x168f   :  { %v4691_v2 = vpop.f32.mrf.mxu0 }
0x1690   :  { %v3550_v1 = vadd.f32 %v5755_v33, %v3547_v41  ;;  %v3843_v41 = vld [vmem:[%s6021_s6 + $0x30] sm:$0xff]  ;;  %v3842_v2 = vld [vmem:[%s6021_s6 + $0x28] sm:$0xff] }
0x1692   :  { %4948 = vtanh.f32 %v3550_v1  ;;  %v4024_v6 = vmul.f32 -1.442695, %v3550_v1  ;;  %v3841_v1 = vld [vmem:[%s6021_s6 + $0x20] sm:$0xff] }
0x1693   :  { %4950 = vpow2.f32 %v4021_v46  ;;  %v3839_v46 = vld [vmem:[%s6021_s6 + $0x10] sm:$0xff] }
0x1694   :  { %4952 = vpow2.f32 %v4024_v6  ;;  %v3838_v6 = vld [vmem:[%s6021_s6 + $0x8] sm:$0xff] }
0x1697   :  { %v4947_v43 = vpop.eup %4946 }
0x1698   :  { %3390 = vrot.lane.b32.xlu0 %v4947_v43, %s5023_s0  ;;  %v3840_v43 = vld [vmem:[%s6021_s6 + $0x18] sm:$0xff] }
0x169f   :  { %v4949_v21 = vpop.eup %4948 }
0x16a0   :  { %3560 = vrot.lane.b32.xlu1 %v4949_v21, %s5023_s0  ;;  %v4951_v48 = vpop.eup %4950 }
0x16a1   :  { %v3384_v60 = vadd.f32 1.0, %v4951_v48  ;;  %v4953_v17 = vpop.eup %4952  ;;  %v3837_v48 = vld [vmem:[%s6021_s6] sm:$0xff] }
0x16a2   :  { %v3554_v61 = vadd.f32 1.0, %v4953_v17 }
0x16a3   :  { %4954 = vrcp.f32 %v3384_v60  ;;  %v4028_v60 = vld [vmem:[%s6020_s5] ss:$0 sm:$0xff] }
0x16a4   :  { %4956 = vrcp.f32 %v3554_v61 }
0x16b0   :  { %v4955_v30 = vpop.eup %4954 }
0x16b1   :  { %v4957_v63 = vpop.eup %4956  ;;  %v3388_v47 = vmul.f32 %v4955_v30, %v5848_v9 }
0x16b2   :  { %v3558_v50 = vmul.f32 %v4957_v63, %v5852_v51 }
0x170a   :  { %v3391_v24 = vpop.permute.xlu0 %3390 }
0x170b   :  { %v3393_v62 = vmul.f32 %v4955_v30, %v3391_v24 }
0x170d   :  { %3395 = vrot.lane.b32.xlu0 %v3393_v62, %s5024_s15  ;;  %v4030_v62 = vld [vmem:[%s6022_s7] ss:$0 sm:$0xff] }
0x1712   :  { %v3561_v4 = vpop.permute.xlu1 %3560 }
0x1713   :  { %v3563_v5 = vmul.f32 %v4957_v63, %v3561_v4 }
0x1715   :  { %3565 = vrot.lane.b32.xlu1 %v3563_v5, %s5024_s15 }
0x177f   :  { %v3396_v38 = vpop.permute.xlu0 %3395 }
0x1780   :  { %v3398_v49 = vadd.f32 %v3396_v38, %v3388_v47 }
0x1782   :  { %4958 = vtanh.f32 %v3398_v49 }
0x1787   :  { %v3566_v42 = vpop.permute.xlu1 %3565 }
0x1788   :  { %v3568_v22 = vadd.f32 %v3566_v42, %v3558_v50 }
0x178a   :  { %4960 = vtanh.f32 %v3568_v22 }
0x178f   :  { %v4959_v8 = vpop.eup %4958 }
0x1790   :  { %3401 = vrot.lane.b32.xlu0 %v4959_v8, %s5023_s0 }
0x1797   :  { %v4961_v54 = vpop.eup %4960 }
0x1798   :  { %3571 = vrot.lane.b32.xlu1 %v4961_v54, %s5023_s0 }
0x1802   :  { %v3402_v3 = vpop.permute.xlu0 %3401 }
0x1803   :  { %v3404_v58 = vmul.f32 %v4955_v30, %v3402_v3 }
0x1805   :  { %3651 = vrot.lane.b32.xlu1 %v3404_v58, %s5024_s15 }
0x180a   :  { %v3572_v55 = vpop.permute.xlu1 %3571 }
0x180b   :  { %v3574_v7 = vmul.f32 %v4957_v63, %v3572_v55 }
0x180d   :  { %3576 = vrot.lane.b32.xlu0 %v3574_v7, %s5024_s15 }
0x1877   :  { %v3652_v59 = vpop.permute.xlu1 %3651 }
0x1878   :  { %4723 = vmatmul.mubr.msk.f32.vlgmr.msra.gmra.mxu1 %vm102_vm1, %v3652_v59 }
0x1879   :  { %4768 = vmatprep.mubr.msk.f32.mxu1 %vm5022_vm0, %v5021_v0  ;;  %4737 = vmatpush3.msra.mxu1 %v3852_v31 }
0x187a   :  { %4738 = vmatprep.subr.mxu1 %v5021_v0 }
0x187b   :  { %4739 = vmatpush3.msra.mxu1 %v3851_v12 }
0x187c   :  { %4740 = vmatprep.subr.mxu1 %v5021_v0 }
0x187d   :  { %4741 = vmatpush3.msra.mxu1 %v3850_v35 }
0x187e   :  { %4742 = vmatprep.subr.mxu1 %v5021_v0 }
0x187f   :  { %v3577_v18 = vpop.permute.xlu0 %3576  ;;  %4743 = vmatpush3.msra.mxu1 %v3849_v15 }
0x1880   :  { %4712 = vmatmul.mubr.msk.f32.vlgmr.msra.gmra.mxu0 %vm102_vm1, %v3577_v18  ;;  %4744 = vmatprep.subr.mxu1 %v5021_v0 }
0x1881   :  { %4733 = vmatprep.mubr.msk.f32.mxu0 %vm5022_vm0, %v5021_v0  ;;  %4745 = vmatpush3.msra.mxu1 %v3848_v28 }
0x1882   :  { %4746 = vmatprep.subr.mxu1 %v5021_v0 }
0x1883   :  { %4747 = vmatpush3.msra.mxu1 %v3847_v16 }
0x1884   :  { %4748 = vmatprep.subr.mxu1 %v5021_v0 }
0x1885   :  { %4749 = vmatpush3.msra.mxu1 %v3846_v14 }
0x1886   :  { %4750 = vmatprep.subr.mxu1 %v5021_v0 }
0x1887   :  { %4751 = vmatpush3.msra.mxu1 %v3845_v57 }
0x1888   :  { %4752 = vmatprep.subr.mxu1 %v5021_v0 }
0x1889   :  { %4753 = vmatpush3.msra.mxu1 %v3844_v19 }
0x188a   :  { %4754 = vmatprep.subr.mxu1 %v5021_v0 }
0x188b   :  { %4755 = vmatpush3.msra.mxu1 %v3843_v41 }
0x188c   :  { %4756 = vmatprep.subr.mxu1 %v5021_v0 }
0x188d   :  { %4757 = vmatpush3.msra.mxu1 %v3842_v2 }
0x188e   :  { %4758 = vmatprep.subr.mxu1 %v5021_v0 }
0x188f   :  { %4759 = vmatpush3.msra.mxu1 %v3841_v1 }
0x1890   :  { %4760 = vmatprep.subr.mxu1 %v5021_v0 }
0x1891   :  { %4761 = vmatpush3.msra.mxu1 %v3840_v43 }
0x1892   :  { %4762 = vmatprep.subr.mxu1 %v5021_v0 }
0x1893   :  { %4763 = vmatpush3.msra.mxu1 %v3839_v46 }
0x1894   :  { %4764 = vmatprep.subr.mxu1 %v5021_v0 }
0x1895   :  { %4765 = vmatpush3.msra.mxu1 %v3838_v6 }
0x1896   :  { %4766 = vmatprep.subr.mxu1 %v5021_v0 }
0x1897   :  { %4767 = vmatpush3.msra.mxu1 %v3837_v48 }
0x1938   :  { %v3721_v20 = vpop.f32.mrf.mxu1 }
0x193a   :  { %v4724_v44 = vpop.f32.mrf.mxu1 }
0x1940   :  { %v3646_v25 = vpop.f32.mrf.mxu0 }
0x1941   :  { %v3722_v45 = vadd.f32 %v3721_v20, %v3646_v25 }
0x1942   :  { %v4713_v34 = vpop.f32.mrf.mxu0 }
0x1943   :  { %v3725_v29 = vadd.f32 %v5755_v33, %v3722_v45  ;;  %v3753_v33 = vld [vmem:[%s6019_s4 + $0x18] sm:$0xff] }
0x1944   :  { %4726 = vmatpush3.msra.mxu0 %v3753_v33 }
0x1945   :  { %4962 = vtanh.f32 %v3725_v29  ;;  %v4027_v9 = vmul.f32 -1.442695, %v3725_v29  ;;  %4727 = vmatprep.subr.mxu0 %v5021_v0 }
0x1946   :  { %4728 = vmatpush3.msra.mxu0 %v3752_v53 }
0x1947   :  { %4964 = vpow2.f32 %v4027_v9  ;;  %4729 = vmatprep.subr.mxu0 %v5021_v0 }
0x1948   :  { %4730 = vmatpush3.msra.mxu0 %v3751_v27 }
0x1949   :  { %4731 = vmatprep.subr.mxu0 %v5021_v0 }
0x194a   :  { %4732 = vmatpush3.msra.mxu0 %v3750_v56 }
0x1952   :  { %v4963_v32 = vpop.eup %4962 }
0x1953   :  { %3735 = vrot.lane.b32.xlu0 %v4963_v32, %s5023_s0 }
0x1954   :  { %v4965_v36 = vpop.eup %4964 }
0x1955   :  { %v3729_v37 = vadd.f32 1.0, %v4965_v36 }
0x1957   :  { %4966 = vrcp.f32 %v3729_v37 }
0x1964   :  { %v4967_v51 = vpop.eup %4966 }
0x1965   :  { %v3733_v39 = vmul.f32 %v4967_v51, %v3568_v22 }
0x19c5   :  { %v3736_v10 = vpop.permute.xlu0 %3735 }
0x19c6   :  { %v3738_v52 = vmul.f32 %v4967_v51, %v3736_v10 }
0x19c8   :  { %3740 = vrot.lane.b32.xlu1 %v3738_v52, %s5024_s15 }
0x1a3a   :  { %v3741_v23 = vpop.permute.xlu1 %3740 }
0x1a3b   :  { %v3743_v40 = vadd.f32 %v3741_v23, %v3733_v39 }
0x1a3d   :  { %4968 = vtanh.f32 %v3743_v40 }
0x1a4a   :  { %v4969_v11 = vpop.eup %4968 }
0x1a4b   :  { %3746 = vrot.lane.b32.xlu0 %v4969_v11, %s5023_s0 }
0x1abd   :  { %v3747_v26 = vpop.permute.xlu0 %3746 }
0x1abe   :  { %v3749_v13 = vmul.f32 %v4967_v51, %v3747_v26 }
0x1ac0   :  { %3762 = vrot.lane.b32.xlu1 %v3749_v13, %s5024_s15 }
0x1b32   :  { %v3763_v21 = vpop.permute.xlu1 %3762 }
0x1b33   :  { %4734 = vmatmul.mubr.msk.f32.vlgmr.msra.gmra.mxu0 %vm102_vm1, %v3763_v21 }
0x1bf3   :  { %v3832_v17 = vpop.f32.mrf.mxu0 }
0x1bf4   :  { %v3833_v61 = vadd.f32 %v4028_v60, %v3832_v17 }
0x1bf5   :  { %v4735_v30 = vpop.f32.mrf.mxu0 }
0x1bf6   :  { %v3836_v24 = vmax.f32 %v3833_v61, 0.0 }
0x1bf8   :  { %4769 = vmatmul.mubr.f32.vlgmr.msra.gmra.mxu1 %v3836_v24 }
0x1cb8   :  { %v3926_v63 = vpop.f32.mrf.mxu1 }
0x1cb9   :  { %v3927_v0 = vadd.f32 %v4030_v62, %v3926_v63 }
0x1cba   :  { %v4770_v4 = vpop.f32.mrf.mxu1 }
0x1cbb   :  { %3930 = vmax.xlane.f32.xlu0 %v3927_v0 }
0x1d44   :  { %v3931_v5 = vpop.xlane.xlu0 %3930 }
0x1d45   :  { %v3932_v47 = vsub.f32 %v3927_v0, %v3931_v5 }
0x1d47   :  { %v3933_v38 = vmul.f32 1.442695, %v3932_v47 }
0x1d49   :  { %4970 = vpow2.f32 %v3933_v38 }
0x1d56   :  { %v4971_v49 = vpop.eup %4970 }
0x1d57   :  { %3935 = vadd.xlane.f32.xlu1 %v4971_v49 }
0x1de0   :  { %v3936_v50 = vpop.xlane.xlu1 %3935 }
0x1de1   :  { %4972 = vlog2.f32 %v3936_v50 }
0x1dee   :  { %v4973_v42 = vpop.eup %4972 }
0x1def   :  { %v3938_v22 = vmul.f32 0.6931472, %v4973_v42 }
0x1df1   :  { %v3939_v8 = vsub.f32 %v3932_v47, %v3938_v22 }
0x1df3   :  { %3940 = vst [vmem:[%s6023_s8] sm:$0xff] %v3939_v8 }
0x1df4   :  { %3945 = vsyncpa [#allocation3], 1 }

</bundles_post_ra>
